<compile_context>
chip_gen: v5e
topology: v5e:2x2
jax: 0.10.0
libtpu: 0.0.40
codegen_flags: <defaults>
</compile_context>

<pallas_src>
import jax
import jax.numpy as jnp
from jax.experimental import pallas as pl
from jax.experimental.pallas import tpu as pltpu

_BN_EPS = 1e-5
_SLOPE = 0.2
_VMEM_BUDGET = 28 * 1024 * 1024          # per-tile working-set budget (bytes)


def _leaky_relu(x, slope=_SLOPE):
    return jnp.where(x >= 0, x, slope * x)


def _bn_affine(gamma, beta, mean, var, eps=_BN_EPS):
    """Eval-mode BatchNorm2d as per-channel affine: y = s*x + t."""
    s = gamma * jax.lax.rsqrt(var + eps)
    return s, beta - s * mean


def _im2col_3x3(x_nhwc, stride):
    """3x3, padding=1 patches. Returns (B*Ho*Wo, 9*C), Ho, Wo."""
    B, H, W, C = x_nhwc.shape
    Ho = (H + 2 - 3) // stride + 1
    Wo = (W + 2 - 3) // stride + 1
    xp = jnp.pad(x_nhwc, ((0, 0), (1, 1), (1, 1), (0, 0)))
    cols = []
    for dy in range(3):
        for dx in range(3):
            cols.append(xp[:, dy:dy + stride * (Ho - 1) + 1:stride,
                              dx:dx + stride * (Wo - 1) + 1:stride, :])
    patches = jnp.concatenate(cols, axis=-1)          # (B, Ho, Wo, 9*C)
    return patches.reshape(B * Ho * Wo, 9 * C), Ho, Wo


def _tile_vmem_bytes(tm, K, CP, in_bytes, out_bytes):
    """Estimated VMEM working set for one grid step (worst case 2 buffers)."""
    return (2 * tm * K * in_bytes          # patch tile (double-buffered)
            + 2 * K * 2 * CP * in_bytes    # fused weight (<= 2 buffers)
            + 2 * 8 * CP * 4               # packed BN affine terms
            + 2 * tm * CP * out_bytes      # output tile (double-buffered)
            + 3 * tm * 2 * CP * 4)         # y / fc / res f32 intermediates


def _pick_tile_m(M, K, CP, in_bytes, out_bytes, budget):
    """Largest sublane-aligned row tile <= 1024 subject to:
       * the per-step working set fitting `budget` (v7x VMEM is 64 MiB),
       * >= 4 grid steps when that doesn't force the tile below 256 rows
         (2 steps per v7x TensorCore with dimension_semantics=("parallel",)).
    """
    cap = 1024
    while cap > 8 and _tile_vmem_bytes(cap, K, CP, in_bytes, out_bytes) > budget:
        cap -= 8
    m8 = max(8, -(-M // 8) * 8)
    if m8 <= min(cap, 256):
        return m8                           # tiny problem: single tile
    tm4 = max(8, (M // 4) // 8 * 8)         # biggest tile giving >= 4 steps
    cand = tm4 if tm4 >= 256 else 256       # never shrink below 256 for steps
    return max(8, min(cap, 1024, cand))


def residual_conv_kernel(p_ref, w_ref, aff_ref, o_ref):
    # p_ref:   (TM, 9*C_in)   im2col patch tile (compute_dtype)
    # w_ref:   (9*C_in, 2*CP) fused [net | rnet] GEMM weights (BN scales folded)
    # aff_ref: (8, CP) f32    rows: [t1, s2, t2, tr, 0, 0, 0, 0]
    # o_ref:   (TM, CP)       lane-dense output tile (valid cols [:C_out])
    cp = o_ref.shape[-1]
    # Single fused MXU pass for both conv branches; f32 accumulation.
    y = jnp.dot(p_ref[...], w_ref[...], preferred_element_type=jnp.float32)
    t1 = aff_ref[0:1, :]
    s2 = aff_ref[1:2, :]
    t2 = aff_ref[2:3, :]
    tr = aff_ref[3:4, :]
    fc = _leaky_relu(y[:, :cp] + t1)             # BN1 + LeakyReLU(0.2)
    fc = fc * s2 + t2                            # BN2
    res = y[:, cp:] + tr                         # conv_rnet + BN_r
    o_ref[...] = _leaky_relu(res + fc).astype(o_ref.dtype)


def residual_conv(x, w_net, bn1, bn2, w_rnet, bnr, *, stride=1,
                  compute_dtype=jnp.bfloat16, out_dtype=None,
                  channels_last=False):
    """ResidualConv forward (use_batch_norm=True, eval-mode BN, dropout=0).

    x:              (B, C_in, H, W) NCHW, or (B, H, W, C_in) if channels_last.
    w_net, w_rnet:  (C_out, C_in, 3, 3) conv weights (bias=False).
    bn1, bn2, bnr:  (gamma, beta, running_mean, running_var) tuples, (C_out,).
    stride:         1 ('same') or 2 ('down').
    compute_dtype:  MXU input dtype (bf16 default); accumulation stays f32.
    out_dtype:      kernel store dtype (default x.dtype); bf16 halves padded
                    store bandwidth when C_out << 128.
    """
    assert stride in (1, 2), "only sampling='same' (1) / 'down' (2) supported"

    x_nhwc = x if channels_last else jnp.transpose(x, (0, 2, 3, 1))
    B, H, W, C_in = x_nhwc.shape
    C_out = w_net.shape[0]
    K = 9 * C_in
    CP = ((C_out + 127) // 128) * 128            # lane-dense channel width
    out_dtype = x.dtype if out_dtype is None else out_dtype

    # ---- wrapper-side layout plumbing (plain JAX) ----
    patches, Ho, Wo = _im2col_3x3(x_nhwc, stride)        # (M, K)
    M = B * Ho * Wo

    s1, t1 = _bn_affine(*bn1)
    s2, t2 = _bn_affine(*bn2)
    sr, tr = _bn_affine(*bnr)

    def _as_gemm_weight(w, scale):
        # (C_out,C_in,3,3) -> (ky,kx,ci,co) -> (9*C_in, C_out), fold BN scale,
        # pad columns to CP so the in-kernel halves land on vreg boundaries.
        wm = jnp.transpose(w, (2, 3, 1, 0)).reshape(K, C_out) * scale[None, :]
        return jnp.pad(wm, ((0, 0), (0, CP - C_out)))

    w_cat = jnp.concatenate(
        [_as_gemm_weight(w_net, s1), _as_gemm_weight(w_rnet, sr)],
        axis=1).astype(compute_dtype)
    patches = patches.astype(compute_dtype)

    # Four f32 per-channel affine terms packed into ONE (8, CP) operand.
    pad_c = lambda v: jnp.pad(v.astype(jnp.float32), (0, CP - C_out))
    affine = jnp.zeros((8, CP), jnp.float32)
    affine = affine.at[0].set(pad_c(t1)).at[1].set(pad_c(s2))
    affine = affine.at[2].set(pad_c(t2)).at[3].set(pad_c(tr))

    in_bytes = jnp.dtype(compute_dtype).itemsize
    out_bytes = jnp.dtype(out_dtype).itemsize
    tm = _pick_tile_m(M, K, CP, in_bytes, out_bytes, _VMEM_BUDGET)
    grid_m = pl.cdiv(M, tm)                      # ragged last block is fine
    vmem_limit = int(min(56 * 2**20,
                         max(32 * 2**20,
                             2 * _tile_vmem_bytes(tm, K, CP, in_bytes,
                                                  out_bytes))))

    def run(single_buffer_consts):
        # Constant-index operands (weight / affine pack): single pipeline
        # buffer saves VMEM (matters on v7x's 64 MiB); allow_input_fusion lets
        # XLA fuse the im2col producer into the patch operand read.
        const_kw = ({"pipeline_mode": pl.Buffered(1)}
                    if single_buffer_consts else {})
        extra_cp = ({"allow_input_fusion": [True, False, False]}
                    if single_buffer_consts else {})
        return pl.pallas_call(
            residual_conv_kernel,
            out_shape=jax.ShapeDtypeStruct((M, CP), out_dtype),
            grid=(grid_m,),
            in_specs=[
                pl.BlockSpec((tm, K), lambda i: (i, 0)),
                pl.BlockSpec((K, 2 * CP), lambda i: (0, 0), **const_kw),
                pl.BlockSpec((8, CP), lambda i: (0, 0), **const_kw),
            ],
            out_specs=pl.BlockSpec((tm, CP), lambda i: (i, 0)),
            compiler_params=pltpu.CompilerParams(
                dimension_semantics=("parallel",),
                vmem_limit_bytes=vmem_limit,
                **extra_cp),
            cost_estimate=pl.CostEstimate(
                flops=2 * M * K * 2 * CP,
                transcendentals=0,
                bytes_accessed=(M * K * in_bytes + K * 2 * CP * in_bytes
                                + M * CP * out_bytes + 8 * CP * 4)),
        )(patches, w_cat, affine)

    try:
        out_flat = run(True)
    except Exception:
        # pl.Buffered(1) / allow_input_fusion not available (or rejected) on
        # this jax/Mosaic version -> fall back to the plain, known-good specs.
        out_flat = run(False)

    out_nhwc = out_flat[:, :C_out].reshape(B, Ho, Wo, C_out)
    return out_nhwc if channels_last else jnp.transpose(out_nhwc, (0, 3, 1, 2))


def residual_conv_ref(x, w_net, bn1, bn2, w_rnet, bnr, *, stride=1,
                      compute_dtype=jnp.float32):
    """Pure-JAX reference mirroring the PyTorch forward (eval-mode BN).

    compute_dtype mirrors the kernel's numerics: BN scale folded into the
    weight, operands cast to compute_dtype, f32 accumulation, f32 epilogue.
    """
    dn = ('NCHW', 'OIHW', 'NCHW')
    s1, t1 = _bn_affine(*bn1)
    s2, t2 = _bn_affine(*bn2)
    sr, tr = _bn_affine(*bnr)

    def conv_bn(inp, w, s, t):
        wf = (w * s[:, None, None, None]).astype(compute_dtype)
        y = jax.lax.conv_general_dilated(
            inp.astype(compute_dtype), wf, window_strides=(stride, stride),
            padding=((1, 1), (1, 1)), dimension_numbers=dn,
            preferred_element_type=jnp.float32)
        return y + t[None, :, None, None]

    out = _leaky_relu(conv_bn(x, w_net, s1, t1))
    out = out * s2[None, :, None, None] + t2[None, :, None, None]
    res = conv_bn(x, w_rnet, sr, tr)
    return _leaky_relu(res + out)


if __name__ == "__main__":
    key = jax.random.PRNGKey(0)
    B, C_in, C_out, H, W = 2, 4, 8, 16, 16

    ks = jax.random.split(key, 6)
    x = jax.random.normal(ks[0], (B, C_in, H, W), dtype=jnp.float32)
    w_net = 0.2 * jax.random.normal(ks[1], (C_out, C_in, 3, 3), jnp.float32)
    w_rnet = 0.2 * jax.random.normal(ks[2], (C_out, C_in, 3, 3), jnp.float32)

    def bn_params(k):
        k1, k2, k3, k4 = jax.random.split(k, 4)
        gamma = 1.0 + 0.1 * jax.random.normal(k1, (C_out,), jnp.float32)
        beta = 0.1 * jax.random.normal(k2, (C_out,), jnp.float32)
        mean = 0.1 * jax.random.normal(k3, (C_out,), jnp.float32)
        var = jnp.abs(1.0 + 0.1 * jax.random.normal(k4, (C_out,), jnp.float32))
        return (gamma, beta, mean, var)

    bn1, bn2, bnr = bn_params(ks[3]), bn_params(ks[4]), bn_params(ks[5])

    # 1) sampling='same' (stride=1), f32 compute path: tight check vs XLA ref.
    out_f32 = jax.block_until_ready(
        residual_conv(x, w_net, bn1, bn2, w_rnet, bnr, stride=1,
                      compute_dtype=jnp.float32))
    ref_f32 = residual_conv_ref(x, w_net, bn1, bn2, w_rnet, bnr, stride=1,
                                compute_dtype=jnp.float32)
    assert out_f32.shape == (B, C_out, H, W)
    assert jnp.allclose(out_f32, ref_f32, atol=1e-4, rtol=1e-4), (
        f"f32 same-path mismatch, max err "
        f"{float(jnp.max(jnp.abs(out_f32 - ref_f32)))}")

    # 2) stride=1, default bf16 compute path vs a bf16-aware reference.
    out_bf = jax.block_until_ready(
        residual_conv(x, w_net, bn1, bn2, w_rnet, bnr, stride=1))
    ref_bf = residual_conv_ref(x, w_net, bn1, bn2, w_rnet, bnr, stride=1,
                               compute_dtype=jnp.bfloat16)
    assert jnp.allclose(out_bf, ref_bf, atol=1e-2, rtol=1e-2), (
        f"bf16 same-path mismatch, max err "
        f"{float(jnp.max(jnp.abs(out_bf - ref_bf)))}")

    # 3) sampling='down' (stride=2), default bf16 compute path.
    out_d = jax.block_until_ready(
        residual_conv(x, w_net, bn1, bn2, w_rnet, bnr, stride=2))
    ref_d = residual_conv_ref(x, w_net, bn1, bn2, w_rnet, bnr, stride=2,
                              compute_dtype=jnp.bfloat16)
    assert out_d.shape == (B, C_out, H // 2, W // 2)
    assert jnp.allclose(out_d, ref_d, atol=1e-2, rtol=1e-2), (
        f"bf16 down-path mismatch, max err "
        f"{float(jnp.max(jnp.abs(out_d - ref_d)))}")

    # 4) channels-last path (no wrapper transposes) matches the NCHW path.
    x_nhwc = jnp.transpose(x, (0, 2, 3, 1))
    out_cl = jax.block_until_ready(
        residual_conv(x_nhwc, w_net, bn1, bn2, w_rnet, bnr, stride=1,
                      channels_last=True))
    assert jnp.allclose(out_cl, jnp.transpose(out_bf, (0, 2, 3, 1)),
                        atol=1e-5), "channels_last path mismatch"

    print("KERNEL_OK")
</pallas_src>

<mosaic_0001>
module attributes {stable_mosaic.version = 11 : i64} {
  func.func @residual_conv_kernel(%arg0: i32, %arg1: memref<256x36xf32, #tpu.memory_space<vmem>>, %arg2: memref<36x256xf32, #tpu.memory_space<vmem>>, %arg3: memref<8x128xf32, #tpu.memory_space<vmem>>, %arg4: memref<256x128xf32, #tpu.memory_space<vmem>>) attributes {dimension_semantics = [#tpu.dimension_semantics<parallel>], iteration_bounds = array<i64: 2>, scalar_prefetch = 0 : i64, scratch_operands = 0 : i64, tpu.core_type = #tpu.core_type<tc>, window_params = [{transform_indices = @transform_0, window_bounds = array<i64: 256, 36>}, {pipeline_mode = #tpu.pipeline_mode<synchronous>, transform_indices = @transform_1, window_bounds = array<i64: 36, 256>}, {pipeline_mode = #tpu.pipeline_mode<synchronous>, transform_indices = @transform_2, window_bounds = array<i64: 8, 128>}, {transform_indices = @transform_3, window_bounds = array<i64: 256, 128>}]} {
    %c0 = arith.constant 0 : index
    %c0_0 = arith.constant 0 : index
    %0 = vector.load %arg1[%c0, %c0_0] : memref<256x36xf32, #tpu.memory_space<vmem>>, vector<256x36xf32>
    %c0_1 = arith.constant 0 : index
    %c0_2 = arith.constant 0 : index
    %1 = vector.load %arg2[%c0_1, %c0_2] : memref<36x256xf32, #tpu.memory_space<vmem>>, vector<36x256xf32>
    %cst = arith.constant dense<0.000000e+00> : vector<256x256xf32>
    %2 = tpu.matmul %0, %1, %cst {dimension_numbers = #tpu.dot_dimension_numbers<[1], [0], [0], [1], [0, 0, 1, 1], [], []>} : vector<256x36xf32>, vector<36x256xf32>, vector<256x256xf32> -> vector<256x256xf32>
    %c0_3 = arith.constant 0 : index
    %c0_4 = arith.constant 0 : index
    %3 = vector.load %arg3[%c0_3, %c0_4] : memref<8x128xf32, #tpu.memory_space<vmem>>, vector<1x128xf32>
    %c1 = arith.constant 1 : index
    %c0_5 = arith.constant 0 : index
    %4 = vector.load %arg3[%c1, %c0_5] : memref<8x128xf32, #tpu.memory_space<vmem>>, vector<1x128xf32>
    %c2 = arith.constant 2 : index
    %c0_6 = arith.constant 0 : index
    %5 = vector.load %arg3[%c2, %c0_6] : memref<8x128xf32, #tpu.memory_space<vmem>>, vector<1x128xf32>
    %c3 = arith.constant 3 : index
    %c0_7 = arith.constant 0 : index
    %6 = vector.load %arg3[%c3, %c0_7] : memref<8x128xf32, #tpu.memory_space<vmem>>, vector<1x128xf32>
    %7 = vector.extract_strided_slice %2 {offsets = [0, 0], sizes = [256, 128], strides = [1, 1]} : vector<256x256xf32> to vector<256x128xf32>
    %8 = vector.broadcast %3 : vector<1x128xf32> to vector<256x128xf32>
    %9 = arith.addf %7, %8 : vector<256x128xf32>
    %cst_8 = arith.constant 0.000000e+00 : f32
    %10 = vector.broadcast %cst_8 : f32 to vector<256x128xf32>
    %11 = arith.cmpf oge, %9, %10 : vector<256x128xf32>
    %cst_9 = arith.constant 2.000000e-01 : f32
    %12 = vector.broadcast %cst_9 : f32 to vector<256x128xf32>
    %13 = arith.mulf %12, %9 : vector<256x128xf32>
    %14 = arith.select %11, %9, %13 : vector<256x128xi1>, vector<256x128xf32>
    %15 = vector.broadcast %4 : vector<1x128xf32> to vector<256x128xf32>
    %16 = arith.mulf %14, %15 : vector<256x128xf32>
    %17 = vector.broadcast %5 : vector<1x128xf32> to vector<256x128xf32>
    %18 = arith.addf %16, %17 : vector<256x128xf32>
    %19 = vector.extract_strided_slice %2 {offsets = [0, 128], sizes = [256, 128], strides = [1, 1]} : vector<256x256xf32> to vector<256x128xf32>
    %20 = vector.broadcast %6 : vector<1x128xf32> to vector<256x128xf32>
    %21 = arith.addf %19, %20 : vector<256x128xf32>
    %22 = arith.addf %21, %18 : vector<256x128xf32>
    %cst_10 = arith.constant 0.000000e+00 : f32
    %23 = vector.broadcast %cst_10 : f32 to vector<256x128xf32>
    %24 = arith.cmpf oge, %22, %23 : vector<256x128xf32>
    %cst_11 = arith.constant 2.000000e-01 : f32
    %25 = vector.broadcast %cst_11 : f32 to vector<256x128xf32>
    %26 = arith.mulf %25, %22 : vector<256x128xf32>
    %27 = arith.select %24, %22, %26 : vector<256x128xi1>, vector<256x128xf32>
    %c0_12 = arith.constant 0 : index
    %c0_13 = arith.constant 0 : index
    %28 = vector.load %arg4[%c0_12, %c0_13] : memref<256x128xf32, #tpu.memory_space<vmem>>, vector<256x128xf32>
    tpu.vector_store %arg4[%c0_12, %c0_13], %27 {strides = array<i32>} : memref<256x128xf32, #tpu.memory_space<vmem>>, vector<256x128xf32>,
    return
  }
  func.func @transform_0(%arg0: i32) -> (i32, i32) {
    %c0_i32 = arith.constant 0 : i32
    %c0_i32_0 = arith.constant 0 : i32
    return %arg0, %c0_i32 : i32, i32
  }
  func.func @transform_1(%arg0: i32) -> (i32, i32) {
    %c0_i32 = arith.constant 0 : i32
    %c0_i32_0 = arith.constant 0 : i32
    %c0_i32_1 = arith.constant 0 : i32
    return %c0_i32, %c0_i32_0 : i32, i32
  }
  func.func @transform_2(%arg0: i32) -> (i32, i32) {
    %c0_i32 = arith.constant 0 : i32
    %c0_i32_0 = arith.constant 0 : i32
    %c0_i32_1 = arith.constant 0 : i32
    return %c0_i32, %c0_i32_0 : i32, i32
  }
  func.func @transform_3(%arg0: i32) -> (i32, i32) {
    %c0_i32 = arith.constant 0 : i32
    %c0_i32_0 = arith.constant 0 : i32
    return %arg0, %c0_i32 : i32, i32
  }
}

module attributes {stable_mosaic.version = 11 : i64} {
  func.func @residual_conv_kernel(%arg0: i32, %arg1: memref<256x36xf32, #tpu.memory_space<vmem>>, %arg2: memref<36x256xf32, #tpu.memory_space<vmem>>, %arg3: memref<8x128xf32, #tpu.memory_space<vmem>>, %arg4: memref<256x128xf32, #tpu.memory_space<vmem>>) attributes {dimension_semantics = [#tpu.dimension_semantics<parallel>], iteration_bounds = array<i64: 2>, scalar_prefetch = 0 : i64, scratch_operands = 0 : i64, tpu.core_type = #tpu.core_type<tc>, window_params = [{transform_indices = @transform_0, window_bounds = array<i64: 256, 36>}, {pipeline_mode = #tpu.pipeline_mode<synchronous>, transform_indices = @transform_1, window_bounds = array<i64: 36, 256>}, {pipeline_mode = #tpu.pipeline_mode<synchronous>, transform_indices = @transform_2, window_bounds = array<i64: 8, 128>}, {transform_indices = @transform_3, window_bounds = array<i64: 256, 128>}]} {
    %c0 = arith.constant 0 : index
    %c0_0 = arith.constant 0 : index
    %0 = vector.load %arg1[%c0, %c0_0] : memref<256x36xf32, #tpu.memory_space<vmem>>, vector<256x36xf32>
    %c0_1 = arith.constant 0 : index
    %c0_2 = arith.constant 0 : index
    %1 = vector.load %arg2[%c0_1, %c0_2] : memref<36x256xf32, #tpu.memory_space<vmem>>, vector<36x256xf32>
    %cst = arith.constant dense<0.000000e+00> : vector<256x256xf32>
    %2 = tpu.matmul %0, %1, %cst {dimension_numbers = #tpu.dot_dimension_numbers<[1], [0], [0], [1], [0, 0, 1, 1], [], []>} : vector<256x36xf32>, vector<36x256xf32>, vector<256x256xf32> -> vector<256x256xf32>
    %c0_3 = arith.constant 0 : index
    %c0_4 = arith.constant 0 : index
    %3 = vector.load %arg3[%c0_3, %c0_4] : memref<8x128xf32, #tpu.memory_space<vmem>>, vector<1x128xf32>
    %c1 = arith.constant 1 : index
    %c0_5 = arith.constant 0 : index
    %4 = vector.load %arg3[%c1, %c0_5] : memref<8x128xf32, #tpu.memory_space<vmem>>, vector<1x128xf32>
    %c2 = arith.constant 2 : index
    %c0_6 = arith.constant 0 : index
    %5 = vector.load %arg3[%c2, %c0_6] : memref<8x128xf32, #tpu.memory_space<vmem>>, vector<1x128xf32>
    %c3 = arith.constant 3 : index
    %c0_7 = arith.constant 0 : index
    %6 = vector.load %arg3[%c3, %c0_7] : memref<8x128xf32, #tpu.memory_space<vmem>>, vector<1x128xf32>
    %7 = vector.extract_strided_slice %2 {offsets = [0, 0], sizes = [256, 128], strides = [1, 1]} : vector<256x256xf32> to vector<256x128xf32>
    %8 = vector.broadcast %3 : vector<1x128xf32> to vector<256x128xf32>
    %9 = arith.addf %7, %8 : vector<256x128xf32>
    %cst_8 = arith.constant 0.000000e+00 : f32
    %10 = vector.broadcast %cst_8 : f32 to vector<256x128xf32>
    %11 = arith.cmpf oge, %9, %10 : vector<256x128xf32>
    %cst_9 = arith.constant 2.000000e-01 : f32
    %12 = vector.broadcast %cst_9 : f32 to vector<256x128xf32>
    %13 = arith.mulf %12, %9 : vector<256x128xf32>
    %14 = arith.select %11, %9, %13 : vector<256x128xi1>, vector<256x128xf32>
    %15 = vector.broadcast %4 : vector<1x128xf32> to vector<256x128xf32>
    %16 = arith.mulf %14, %15 : vector<256x128xf32>
    %17 = vector.broadcast %5 : vector<1x128xf32> to vector<256x128xf32>
    %18 = arith.addf %16, %17 : vector<256x128xf32>
    %19 = vector.extract_strided_slice %2 {offsets = [0, 128], sizes = [256, 128], strides = [1, 1]} : vector<256x256xf32> to vector<256x128xf32>
    %20 = vector.broadcast %6 : vector<1x128xf32> to vector<256x128xf32>
    %21 = arith.addf %19, %20 : vector<256x128xf32>
    %22 = arith.addf %21, %18 : vector<256x128xf32>
    %cst_10 = arith.constant 0.000000e+00 : f32
    %23 = vector.broadcast %cst_10 : f32 to vector<256x128xf32>
    %24 = arith.cmpf oge, %22, %23 : vector<256x128xf32>
    %cst_11 = arith.constant 2.000000e-01 : f32
    %25 = vector.broadcast %cst_11 : f32 to vector<256x128xf32>
    %26 = arith.mulf %25, %22 : vector<256x128xf32>
    %27 = arith.select %24, %22, %26 : vector<256x128xi1>, vector<256x128xf32>
    %c0_12 = arith.constant 0 : index
    %c0_13 = arith.constant 0 : index
    %28 = vector.load %arg4[%c0_12, %c0_13] : memref<256x128xf32, #tpu.memory_space<vmem>>, vector<256x128xf32>
    tpu.vector_store %arg4[%c0_12, %c0_13], %27 {strides = array<i32>} : memref<256x128xf32, #tpu.memory_space<vmem>>, vector<256x128xf32>,
    return
  }
  func.func @transform_0(%arg0: i32) -> (i32, i32) {
    %c0_i32 = arith.constant 0 : i32
    %c0_i32_0 = arith.constant 0 : i32
    return %arg0, %c0_i32 : i32, i32
  }
  func.func @transform_1(%arg0: i32) -> (i32, i32) {
    %c0_i32 = arith.constant 0 : i32
    %c0_i32_0 = arith.constant 0 : i32
    %c0_i32_1 = arith.constant 0 : i32
    return %c0_i32, %c0_i32_0 : i32, i32
  }
  func.func @transform_2(%arg0: i32) -> (i32, i32) {
    %c0_i32 = arith.constant 0 : i32
    %c0_i32_0 = arith.constant 0 : i32
    %c0_i32_1 = arith.constant 0 : i32
    return %c0_i32, %c0_i32_0 : i32, i32
  }
  func.func @transform_3(%arg0: i32) -> (i32, i32) {
    %c0_i32 = arith.constant 0 : i32
    %c0_i32_0 = arith.constant 0 : i32
    return %arg0, %c0_i32 : i32, i32
  }
}

</mosaic_0001>

<bundles_post_ra>
// kernel: tpu_custom_call.1
= control target key start
LH: loop header
LB: loop body
LE: loop exit
PB: predicated region body
PF: predicated region fallthrough
CT: control target
= control target key end

     0   :  { %8 = vsyncpa [#allocation3], 0  ;;  %s1633_s0 = inlined_call_operand.vmem [shape: f32[512,36], index: 0, kind: input, shape index: {}]   ;;  %s1634_s1 = inlined_call_operand.vmem [shape: f32[36,256], index: 1, kind: input, shape index: {}]   ;;  %s1635_s2 = inlined_call_operand.vmem [shape: f32[8,128], index: 2, kind: input, shape index: {}]   ;;  %s1636_s3 = inlined_call_operand.hbm [shape: f32[512,128], index: 3, kind: output, shape index: {}]  }
   0x1   :  { %10 = vsyncpa [#allocation3 + $0x1], 0  ;;  %s1234_s12 = smov 0   ;;  %s1236_s13 = smov 0  }
   0x2   :  { %s1238_s14 = smov 0   ;;  %s1240_s15 = smov 0  }
   0x3 LB: > { %s1255_s16 = sadd.s32 4294967295, %s1210_s15   ;;  %s1014_s17 = sadd.s32 4294967294, %s1210_s15   ;;  %s1210_s15 = sphi %s1240_s15, %s1642_s15   ;;  %s1206_s14 = sphi %s1238_s14, %s1641_s14   ;;  %s1202_s13 = sphi %s1236_s13, %s1640_s13   ;;  %s1198_s12 = sphi %s1234_s12, %s1639_s12  }
   0x4   : > { %s1259_s18 = sadd.s32 1, %s1210_s15   ;;  %s91_s19 = sadd.s32 1, %s1206_s14 }
   0x5   : > { %s88_s20 = ssub.s32 %s1210_s15, %s1259_s18  ;;  %p101_p0 = scmp.ne.s32.totalorder %s1206_s14, %s1202_s13 }
   0x6   : > { %p89_p1 = scmp.eq.s32.totalorder %s88_s20, 0  ;;  %p102_p2 = scmp.eq.s32.totalorder %s1255_s16, 1 }
   0x7   : > { %p107_p3 = scmp.ne.s32.totalorder %s1202_s13, %s1198_s12  ;;  %p108_p4 = scmp.eq.s32.totalorder %s1014_s17, 1 }
   0x8   : > { %s1270_s21 = scalar_select %p89_p1, %s1206_s14, %s91_s19  }
   0x9   : > { %p1272_p5 = por %p102_p2, %p101_p0  ;;  %p1276_p6 = por %p108_p4, %p107_p3 }
   0xa   : > { %p1017_p7 = scmp.ge.s32.totalorder %s1210_s15, 1  ;;  %p141_p8 = scmp.lt.s32.totalorder %s1210_s15, 3 }
   0xc   : > { %p142_p9 = pnand %p1017_p7, %p141_p8 }
   0xd   : > { %s1019_s28 = sshll.u32 (!%p142_p9), %s1255_s16, 5  ;;  %s1092_s24 = sshll.u32 (!%p142_p9), %s1255_s16, 8 }
   0xe   : > { %145 = sbr.rel (%p142_p9) target bundleno = 299 (0x12b), region = 32  ;;  %p166_p10 = scmp.lt.s32.totalorder (!%p142_p9), %s1019_s28, 63 }
   0xf   : > { %s948_s27 = scalar_lea.hbm (!%p142_p9), %s1636_s3, %s1092_s24  ;;  %s1168_s7 = scalar_lea.hbm (!%p142_p9), %s1636_s3, 512 }
  0x13   : > { %v212_v0 = vld [vmem:[%s1634_s1 + $0x40] sm:$0xf]  ;;  %vm311_vm0 = vcmask 1043456   ;;  %v210_v1 = vld [vmem:[%s1634_s1 + $0x30] sm:$0xff]  ;;  %v213_v2 = vld [vmem:[%s1634_s1 + $0x48] sm:$0xf] }
  0x14   : > { %1093 = vmatpush.msk.msra.mxu2 %vm311_vm0, %v212_v0  ;;  %1021 = vmatpush.msk.msra.mxu0 %vm311_vm0, %v212_v0  ;;  %v208_v3 = vld [vmem:[%s1634_s1 + $0x20] sm:$0xff]  ;;  %v211_v4 = vld [vmem:[%s1634_s1 + $0x38] sm:$0xff]  ;;  %s1644_s28 = smov (!%p166_p10, %s1019_s28), 63  ;;  %v209_v5 = vld [vmem:[%s1634_s1 + $0x28] sm:$0xff]  ;;  %vm214_vm1 = vcmask 293888  }
  0x15   : > { %1098 = vmatpush.msk.msra.mxu3 %vm311_vm0, %v213_v2  ;;  %1054 = vmatpush.msk.msra.mxu1 %vm311_vm0, %v213_v2  ;;  %v206_v6 = vld [vmem:[%s1634_s1 + $0x10] sm:$0xff]  ;;  %s1020_s17 = sshll.u32 %s1644_s28, 3  ;;  %v207_v7 = vld [vmem:[%s1634_s1 + $0x18] sm:$0xff]  ;;  %v204_v8 = vld [vmem:[%s1634_s1] sm:$0xff] }
  0x16   : > { %1094 = vmatpush.msra.mxu2 %v210_v1  ;;  %330 = vmatpush.msra.mxu0 %v210_v1  ;;  %s1313_s29 = scalar_lea.vmem %s1633_s0, %s1020_s17  ;;  %v205_v11 = vld [vmem:[%s1634_s1 + $0x8] sm:$0xff]  ;;  %v1415_v42 = vld [vmem:[%s1635_s2] ss:$0 sm:$0xff]  ;;  %v1423_v45 = vld [vmem:[%s1635_s2 + $0x1] ss:$0 sm:$0xff]  ;;  %s162_s17 = sand.u32 1, %s1202_s13  }
  0x17   : > { %1099 = vmatpush.msra.mxu3 %v211_v4  ;;  %443 = vmatpush.msra.mxu1 %v211_v4  ;;  %v188_v9 = vld [vmem:[%s1313_s29 + $0x80] sm:$0xff]  ;;  %v189_v12 = vld [vmem:[%s1313_s29 + $0x88] sm:$0xff]  ;;  %v190_v14 = vld [vmem:[%s1313_s29 + $0x90] sm:$0xff]  ;;  %s1018_s19 = sshll.u32 %s162_s17, 8  ;;  %s937_s28 = scalar_lea.sflag [#allocation3], %s162_s17 }
  0x18   : > { %1095 = vmatpush.msra.mxu2 %v208_v3  ;;  %331 = vmatpush.msra.mxu0 %v208_v3  ;;  %v172_v10 = vld [vmem:[%s1313_s29] sm:$0xff]  ;;  %v173_v13 = vld [vmem:[%s1313_s29 + $0x8] sm:$0xff]  ;;  %v174_v15 = vld [vmem:[%s1313_s29 + $0x10] sm:$0xff]  ;;  %s1448_s20 = scalar_lea.vmem [#allocation2], %s1018_s19 }
  0x19   : > { %1100 = vmatpush.msra.mxu3 %v209_v5  ;;  %444 = vmatpush.msra.mxu1 %v209_v5  ;;  %v191_v16 = vld [vmem:[%s1313_s29 + $0x98] sm:$0xff]  ;;  %v192_v18 = vld [vmem:[%s1313_s29 + $0xa0] sm:$0xff]  ;;  %v193_v20 = vld [vmem:[%s1313_s29 + $0xa8] sm:$0xff]  ;;  %s949_s16 = sshll.u32 %s1448_s20, 4  ;;  %s950_s16 = int_to_ptr.vmem [resolvable:$true] %s949_s16 }
  0x1a   : > { %1096 = vmatpush.msra.mxu2 %v206_v6  ;;  %332 = vmatpush.msra.mxu0 %v206_v6  ;;  %v175_v17 = vld [vmem:[%s1313_s29 + $0x18] sm:$0xff]  ;;  %v176_v19 = vld [vmem:[%s1313_s29 + $0x20] sm:$0xff]  ;;  %v177_v21 = vld [vmem:[%s1313_s29 + $0x28] sm:$0xff] }
  0x1b   : > { %1101 = vmatpush.msra.mxu3 %v207_v7  ;;  %445 = vmatpush.msra.mxu1 %v207_v7  ;;  %v194_v22 = vld [vmem:[%s1313_s29 + $0xb0] sm:$0xff]  ;;  %v195_v24 = vld [vmem:[%s1313_s29 + $0xb8] sm:$0xff]  ;;  %v196_v26 = vld [vmem:[%s1313_s29 + $0xc0] sm:$0xff] }
  0x1c   : > { %1097 = vmatpush.msra.mxu2 %v204_v8  ;;  %333 = vmatpush.msra.mxu0 %v204_v8  ;;  %v178_v23 = vld [vmem:[%s1313_s29 + $0x30] sm:$0xff]  ;;  %v179_v25 = vld [vmem:[%s1313_s29 + $0x38] sm:$0xff]  ;;  %v180_v27 = vld [vmem:[%s1313_s29 + $0x40] sm:$0xff] }
  0x1d   : > { %1038 = vmatmul.msk.f32.vlgmr.msra.gmra.mxu2 %vm214_vm1, %v188_v9  ;;  %1022 = vmatmul.msk.f32.vlgmr.msra.gmra.mxu0 %vm214_vm1, %v172_v10  ;;  %v197_v28 = vld [vmem:[%s1313_s29 + $0xc8] sm:$0xff]  ;;  %v198_v30 = vld [vmem:[%s1313_s29 + $0xd0] sm:$0xff]  ;;  %v199_v32 = vld [vmem:[%s1313_s29 + $0xd8] sm:$0xff] }
  0x1e   : > { %1102 = vmatpush.msra.mxu3 %v205_v11  ;;  %446 = vmatpush.msra.mxu1 %v205_v11  ;;  %v181_v29 = vld [vmem:[%s1313_s29 + $0x48] sm:$0xff]  ;;  %v182_v31 = vld [vmem:[%s1313_s29 + $0x50] sm:$0xff]  ;;  %v183_v33 = vld [vmem:[%s1313_s29 + $0x58] sm:$0xff] }
  0x1f   : > { %1071 = vmatmul.msk.f32.vlgmr.msra.gmra.mxu3 %vm214_vm1, %v188_v9  ;;  %1055 = vmatmul.msk.f32.vlgmr.msra.gmra.mxu1 %vm214_vm1, %v172_v10  ;;  %v200_v34 = vld [vmem:[%s1313_s29 + $0xe0] sm:$0xff]  ;;  %v201_v36 = vld [vmem:[%s1313_s29 + $0xe8] sm:$0xff]  ;;  %v202_v38 = vld [vmem:[%s1313_s29 + $0xf0] sm:$0xff] }
  0x20   : > { %v184_v35 = vld [vmem:[%s1313_s29 + $0x60] sm:$0xff]  ;;  %v185_v37 = vld [vmem:[%s1313_s29 + $0x68] sm:$0xff]  ;;  %v186_v39 = vld [vmem:[%s1313_s29 + $0x70] sm:$0xff] }
  0x21   : > { %v203_v40 = vld [vmem:[%s1313_s29 + $0xf8] sm:$0xff]  ;;  %v1428_v47 = vld [vmem:[%s1635_s2 + $0x3] ss:$0 sm:$0xff]  ;;  %v1433_v49 = vld [vmem:[%s1635_s2 + $0x2] ss:$0 sm:$0xff] }
  0x22   : > { %v187_v41 = vld [vmem:[%s1313_s29 + $0x78] sm:$0xff]  ;;  %s951_s29 = sshll.u32 %s948_s27, 4  ;;  %s952_s29 = int_to_ptr.hbm [resolvable:$true] %s951_s29 }
  0x23   : > { %s1162_s30 = sshra.s32 %s952_s29, 4  ;;  %s1163_s30 = int_to_ptr.hbm [resolvable:$true] %s1162_s30 }
  0x24   : > { %s1164_s4 = scalar_lea.hbm %s1163_s30, 256  ;;  %p1169_p0 = scmp.lt.s32.totalorder %s1163_s30, %s1636_s3 }
  0x25   : > { %1039 = vmatmul.msk.f32.gmra.mxu2 %vm214_vm1, %v189_v12  ;;  %1023 = vmatmul.msk.f32.gmra.mxu0 %vm214_vm1, %v173_v13  ;;  %p1165_p11 = scmp.ne.s32.totalorder %s1163_s30, %s1164_s4  ;;  %p1170_p1 = scmp.lt.s32.totalorder %s1168_s7, %s1164_s4 }
  0x27   : > { %1072 = vmatmul.msk.f32.gmra.mxu3 %vm214_vm1, %v189_v12  ;;  %1056 = vmatmul.msk.f32.gmra.mxu1 %vm214_vm1, %v173_v13  ;;  %p1166_p12 = pnand %p1165_p11, %p1272_p5  ;;  %p1171_p2 = por %p1170_p1, %p1169_p0 }
  0x29   : > { %p1167_p13 = pneg %p1166_p12 }
  0x2b   : > { %p1172_p3 = pnand %p1171_p2, %p1167_p13 }
  0x2d   : > { %1040 = vmatmul.msk.f32.gmra.mxu2 %vm214_vm1, %v190_v14  ;;  %1024 = vmatmul.msk.f32.gmra.mxu0 %vm214_vm1, %v174_v15 }
  0x2f   : > { %1073 = vmatmul.msk.f32.gmra.mxu3 %vm214_vm1, %v190_v14  ;;  %1057 = vmatmul.msk.f32.gmra.mxu1 %vm214_vm1, %v174_v15 }
  0x35   : > { %1041 = vmatmul.msk.f32.gmra.mxu2 %vm214_vm1, %v191_v16  ;;  %1025 = vmatmul.msk.f32.gmra.mxu0 %vm214_vm1, %v175_v17 }
  0x37   : > { %1074 = vmatmul.msk.f32.gmra.mxu3 %vm214_vm1, %v191_v16  ;;  %1058 = vmatmul.msk.f32.gmra.mxu1 %vm214_vm1, %v175_v17 }
  0x3d   : > { %1042 = vmatmul.msk.f32.gmra.mxu2 %vm214_vm1, %v192_v18  ;;  %1026 = vmatmul.msk.f32.gmra.mxu0 %vm214_vm1, %v176_v19 }
  0x3f   : > { %1075 = vmatmul.msk.f32.gmra.mxu3 %vm214_vm1, %v192_v18  ;;  %1059 = vmatmul.msk.f32.gmra.mxu1 %vm214_vm1, %v176_v19 }
  0x45   : > { %1043 = vmatmul.msk.f32.gmra.mxu2 %vm214_vm1, %v193_v20  ;;  %1027 = vmatmul.msk.f32.gmra.mxu0 %vm214_vm1, %v177_v21 }
  0x47   : > { %1076 = vmatmul.msk.f32.gmra.mxu3 %vm214_vm1, %v193_v20  ;;  %1060 = vmatmul.msk.f32.gmra.mxu1 %vm214_vm1, %v177_v21 }
  0x4d   : > { %1044 = vmatmul.msk.f32.gmra.mxu2 %vm214_vm1, %v194_v22  ;;  %1028 = vmatmul.msk.f32.gmra.mxu0 %vm214_vm1, %v178_v23 }
  0x4f   : > { %1077 = vmatmul.msk.f32.gmra.mxu3 %vm214_vm1, %v194_v22  ;;  %1061 = vmatmul.msk.f32.gmra.mxu1 %vm214_vm1, %v178_v23 }
  0x55   : > { %1045 = vmatmul.msk.f32.gmra.mxu2 %vm214_vm1, %v195_v24  ;;  %1029 = vmatmul.msk.f32.gmra.mxu0 %vm214_vm1, %v179_v25 }
  0x57   : > { %1078 = vmatmul.msk.f32.gmra.mxu3 %vm214_vm1, %v195_v24  ;;  %1062 = vmatmul.msk.f32.gmra.mxu1 %vm214_vm1, %v179_v25 }
  0x5d   : > { %1046 = vmatmul.msk.f32.gmra.mxu2 %vm214_vm1, %v196_v26  ;;  %1030 = vmatmul.msk.f32.gmra.mxu0 %vm214_vm1, %v180_v27 }
  0x5f   : > { %1079 = vmatmul.msk.f32.gmra.mxu3 %vm214_vm1, %v196_v26  ;;  %1063 = vmatmul.msk.f32.gmra.mxu1 %vm214_vm1, %v180_v27 }
  0x65   : > { %1047 = vmatmul.msk.f32.gmra.mxu2 %vm214_vm1, %v197_v28  ;;  %1031 = vmatmul.msk.f32.gmra.mxu0 %vm214_vm1, %v181_v29 }
  0x67   : > { %1080 = vmatmul.msk.f32.gmra.mxu3 %vm214_vm1, %v197_v28  ;;  %1064 = vmatmul.msk.f32.gmra.mxu1 %vm214_vm1, %v181_v29 }
  0x6d   : > { %1048 = vmatmul.msk.f32.gmra.mxu2 %vm214_vm1, %v198_v30  ;;  %1032 = vmatmul.msk.f32.gmra.mxu0 %vm214_vm1, %v182_v31 }
  0x6f   : > { %1081 = vmatmul.msk.f32.gmra.mxu3 %vm214_vm1, %v198_v30  ;;  %1065 = vmatmul.msk.f32.gmra.mxu1 %vm214_vm1, %v182_v31 }
  0x75   : > { %1049 = vmatmul.msk.f32.gmra.mxu2 %vm214_vm1, %v199_v32  ;;  %1033 = vmatmul.msk.f32.gmra.mxu0 %vm214_vm1, %v183_v33 }
  0x77   : > { %1082 = vmatmul.msk.f32.gmra.mxu3 %vm214_vm1, %v199_v32  ;;  %1066 = vmatmul.msk.f32.gmra.mxu1 %vm214_vm1, %v183_v33 }
  0x7d   : > { %1050 = vmatmul.msk.f32.gmra.mxu2 %vm214_vm1, %v200_v34  ;;  %1034 = vmatmul.msk.f32.gmra.mxu0 %vm214_vm1, %v184_v35 }
  0x7f   : > { %1083 = vmatmul.msk.f32.gmra.mxu3 %vm214_vm1, %v200_v34  ;;  %1067 = vmatmul.msk.f32.gmra.mxu1 %vm214_vm1, %v184_v35 }
  0x85   : > { %1051 = vmatmul.msk.f32.gmra.mxu2 %vm214_vm1, %v201_v36  ;;  %1035 = vmatmul.msk.f32.gmra.mxu0 %vm214_vm1, %v185_v37 }
  0x87   : > { %1084 = vmatmul.msk.f32.gmra.mxu3 %vm214_vm1, %v201_v36  ;;  %1068 = vmatmul.msk.f32.gmra.mxu1 %vm214_vm1, %v185_v37 }
  0x8d   : > { %1052 = vmatmul.msk.f32.gmra.mxu2 %vm214_vm1, %v202_v38  ;;  %1036 = vmatmul.msk.f32.gmra.mxu0 %vm214_vm1, %v186_v39 }
  0x8f   : > { %1085 = vmatmul.msk.f32.gmra.mxu3 %vm214_vm1, %v202_v38  ;;  %1069 = vmatmul.msk.f32.gmra.mxu1 %vm214_vm1, %v186_v39 }
  0x95   : > { %1053 = vmatmul.msk.f32.gmra.mxu2 %vm214_vm1, %v203_v40  ;;  %1037 = vmatmul.msk.f32.gmra.mxu0 %vm214_vm1, %v187_v41 }
  0x97   : > { %1086 = vmatmul.msk.f32.gmra.mxu3 %vm214_vm1, %v203_v40  ;;  %1070 = vmatmul.msk.f32.gmra.mxu1 %vm214_vm1, %v187_v41 }
  0x9a   : > { %v335_v43 = vpop.f32.mrf.mxu0 }
  0x9b   : > { %v549_v44 = vadd.f32 %v1415_v42, %v335_v43 }
  0x9c   : > { %v448_v46 = vpop.f32.mrf.mxu1 }
  0x9d   : > { %vm581_vm2 = vcmp.ge.f32.partialorder %v549_v44, 0.0  ;;  %v613_v48 = vmul.f32 0.2, %v549_v44  ;;  %v744_v53 = vadd.f32 %v1428_v47, %v448_v46 }
  0x9f   : > { %v645_v50 = vsel %vm581_vm2, %v549_v44, %v613_v48 }
  0xa0   : > { %v678_v51 = vmul.f32 %v1423_v45, %v645_v50  ;;  %v383_v52 = vpop.f32.mrf.mxu2 }
  0xa1   : > { %v565_v54 = vadd.f32 %v1415_v42, %v383_v52 }
  0xa2   : > { %v711_v55 = vadd.f32 %v1433_v49, %v678_v51  ;;  %v338_v56 = vpop.f32.mrf.mxu0  ;;  %v496_v57 = vpop.f32.mrf.mxu3 }
  0xa3   : > { %vm597_vm3 = vcmp.ge.f32.partialorder %v565_v54, 0.0  ;;  %v629_v58 = vmul.f32 0.2, %v565_v54  ;;  %v550_v59 = vadd.f32 %v1415_v42, %v338_v56  ;;  %v760_v2 = vadd.f32 %v1428_v47, %v496_v57 }
  0xa4   : > { %v776_v60 = vadd.f32 %v744_v53, %v711_v55  ;;  %v451_v61 = vpop.f32.mrf.mxu1 }
  0xa5   : > { %v661_v62 = vsel %vm597_vm3, %v565_v54, %v629_v58  ;;  %vm582_vm4 = vcmp.ge.f32.partialorder %v550_v59, 0.0  ;;  %v614_v63 = vmul.f32 0.2, %v550_v59  ;;  %v745_v8 = vadd.f32 %v1428_v47, %v451_v61 }
  0xa6   : > { %v694_v0 = vmul.f32 %v1423_v45, %v661_v62  ;;  %vm808_vm5 = vcmp.ge.f32.partialorder %v776_v60, 0.0  ;;  %v840_v1 = vmul.f32 0.2, %v776_v60 }
  0xa7   : > { %v646_v3 = vsel %vm582_vm4, %v550_v59, %v614_v63 }
  0xa8   : > { %v872_v4 = vsel %vm808_vm5, %v776_v60, %v840_v1  ;;  %v679_v5 = vmul.f32 %v1423_v45, %v646_v3  ;;  %v727_v6 = vadd.f32 %v1433_v49, %v694_v0  ;;  %v386_v7 = vpop.f32.mrf.mxu2 }
  0xa9   : > { %904 = vst [vmem:[%s1448_s20] sm:$0xff] %v872_v4  ;;  %v566_v9 = vadd.f32 %v1415_v42, %v386_v7 }
  0xaa   : > { %v792_v10 = vadd.f32 %v760_v2, %v727_v6  ;;  %v712_v11 = vadd.f32 %v1433_v49, %v679_v5  ;;  %v341_v12 = vpop.f32.mrf.mxu0  ;;  %v499_v13 = vpop.f32.mrf.mxu3 }
  0xab   : > { %vm598_vm6 = vcmp.ge.f32.partialorder %v566_v9, 0.0  ;;  %v630_v14 = vmul.f32 0.2, %v566_v9  ;;  %v551_v15 = vadd.f32 %v1415_v42, %v341_v12  ;;  %v761_v21 = vadd.f32 %v1428_v47, %v499_v13 }
  0xac   : > { %vm824_vm7 = vcmp.ge.f32.partialorder %v792_v10, 0.0  ;;  %v856_v16 = vmul.f32 0.2, %v792_v10  ;;  %v777_v17 = vadd.f32 %v745_v8, %v712_v11  ;;  %v454_v18 = vpop.f32.mrf.mxu1 }
  0xad   : > { %v662_v19 = vsel %vm598_vm6, %v566_v9, %v630_v14  ;;  %vm583_vm8 = vcmp.ge.f32.partialorder %v551_v15, 0.0  ;;  %v615_v20 = vmul.f32 0.2, %v551_v15  ;;  %v746_v30 = vadd.f32 %v1428_v47, %v454_v18 }
  0xae   : > { %v888_v22 = vsel %vm824_vm7, %v792_v10, %v856_v16  ;;  %v695_v23 = vmul.f32 %v1423_v45, %v662_v19  ;;  %vm809_vm9 = vcmp.ge.f32.partialorder %v777_v17, 0.0  ;;  %v841_v24 = vmul.f32 0.2, %v777_v17 }
  0xaf   : > { %920 = vst [vmem:[%s1448_s20 + $0x80] sm:$0xff] %v888_v22  ;;  %v647_v25 = vsel %vm583_vm8, %v551_v15, %v615_v20 }
  0xb0   : > { %v873_v26 = vsel %vm809_vm9, %v777_v17, %v841_v24  ;;  %v680_v27 = vmul.f32 %v1423_v45, %v647_v25  ;;  %v728_v28 = vadd.f32 %v1433_v49, %v695_v23  ;;  %v389_v29 = vpop.f32.mrf.mxu2 }
  0xb1   : > { %905 = vst [vmem:[%s1448_s20 + $0x8] sm:$0xff] %v873_v26  ;;  %v567_v31 = vadd.f32 %v1415_v42, %v389_v29 }
  0xb2   : > { %v793_v32 = vadd.f32 %v761_v21, %v728_v28  ;;  %v713_v33 = vadd.f32 %v1433_v49, %v680_v27  ;;  %v344_v34 = vpop.f32.mrf.mxu0  ;;  %v502_v35 = vpop.f32.mrf.mxu3 }
  0xb3   : > { %vm599_vm10 = vcmp.ge.f32.partialorder %v567_v31, 0.0  ;;  %v631_v36 = vmul.f32 0.2, %v567_v31  ;;  %v552_v37 = vadd.f32 %v1415_v42, %v344_v34  ;;  %v762_v44 = vadd.f32 %v1428_v47, %v502_v35 }
  0xb4   : > { %vm825_vm11 = vcmp.ge.f32.partialorder %v793_v32, 0.0  ;;  %v857_v38 = vmul.f32 0.2, %v793_v32  ;;  %v778_v39 = vadd.f32 %v746_v30, %v713_v33  ;;  %v457_v40 = vpop.f32.mrf.mxu1 }
  0xb5   : > { %v663_v41 = vsel %vm599_vm10, %v567_v31, %v631_v36  ;;  %vm584_vm12 = vcmp.ge.f32.partialorder %v552_v37, 0.0  ;;  %v616_v43 = vmul.f32 0.2, %v552_v37  ;;  %v747_v56 = vadd.f32 %v1428_v47, %v457_v40 }
  0xb6   : > { %v889_v46 = vsel %vm825_vm11, %v793_v32, %v857_v38  ;;  %v696_v48 = vmul.f32 %v1423_v45, %v663_v41  ;;  %vm810_vm13 = vcmp.ge.f32.partialorder %v778_v39, 0.0  ;;  %v842_v50 = vmul.f32 0.2, %v778_v39 }
  0xb7   : > { %921 = vst [vmem:[%s1448_s20 + $0x88] sm:$0xff] %v889_v46  ;;  %v648_v51 = vsel %vm584_vm12, %v552_v37, %v616_v43 }
  0xb8   : > { %v874_v52 = vsel %vm810_vm13, %v778_v39, %v842_v50  ;;  %v681_v53 = vmul.f32 %v1423_v45, %v648_v51  ;;  %v729_v54 = vadd.f32 %v1433_v49, %v696_v48  ;;  %v392_v55 = vpop.f32.mrf.mxu2 }
  0xb9   : > { %906 = vst [vmem:[%s1448_s20 + $0x10] sm:$0xff] %v874_v52  ;;  %v568_v57 = vadd.f32 %v1415_v42, %v392_v55 }
  0xba   : > { %v794_v58 = vadd.f32 %v762_v44, %v729_v54  ;;  %v714_v59 = vadd.f32 %v1433_v49, %v681_v53  ;;  %v347_v60 = vpop.f32.mrf.mxu0  ;;  %v505_v61 = vpop.f32.mrf.mxu3 }
  0xbb   : > { %vm600_vm14 = vcmp.ge.f32.partialorder %v568_v57, 0.0  ;;  %v632_v62 = vmul.f32 0.2, %v568_v57  ;;  %v553_v63 = vadd.f32 %v1415_v42, %v347_v60  ;;  %v763_v5 = vadd.f32 %v1428_v47, %v505_v61 }
  0xbc   : > { %vm826_vm15 = vcmp.ge.f32.partialorder %v794_v58, 0.0  ;;  %v858_v0 = vmul.f32 0.2, %v794_v58  ;;  %v779_v1 = vadd.f32 %v747_v56, %v714_v59  ;;  %v460_v2 = vpop.f32.mrf.mxu1 }
  0xbd   : > { %v664_v3 = vsel %vm600_vm14, %v568_v57, %v632_v62  ;;  %vm585_vm0 = vcmp.ge.f32.partialorder %v553_v63, 0.0  ;;  %v617_v4 = vmul.f32 0.2, %v553_v63  ;;  %v748_v14 = vadd.f32 %v1428_v47, %v460_v2 }
  0xbe   : > { %v890_v6 = vsel %vm826_vm15, %v794_v58, %v858_v0  ;;  %v697_v7 = vmul.f32 %v1423_v45, %v664_v3  ;;  %vm811_vm1 = vcmp.ge.f32.partialorder %v779_v1, 0.0  ;;  %v843_v8 = vmul.f32 0.2, %v779_v1 }
  0xbf   : > { %922 = vst [vmem:[%s1448_s20 + $0x90] sm:$0xff] %v890_v6  ;;  %v649_v9 = vsel %vm585_vm0, %v553_v63, %v617_v4 }
  0xc0   : > { %v875_v10 = vsel %vm811_vm1, %v779_v1, %v843_v8  ;;  %v682_v11 = vmul.f32 %v1423_v45, %v649_v9  ;;  %v730_v12 = vadd.f32 %v1433_v49, %v697_v7  ;;  %v395_v13 = vpop.f32.mrf.mxu2 }
  0xc1   : > { %907 = vst [vmem:[%s1448_s20 + $0x18] sm:$0xff] %v875_v10  ;;  %v569_v15 = vadd.f32 %v1415_v42, %v395_v13 }
  0xc2   : > { %v795_v16 = vadd.f32 %v763_v5, %v730_v12  ;;  %v715_v17 = vadd.f32 %v1433_v49, %v682_v11  ;;  %v350_v18 = vpop.f32.mrf.mxu0  ;;  %v508_v19 = vpop.f32.mrf.mxu3 }
  0xc3   : > { %vm601_vm2 = vcmp.ge.f32.partialorder %v569_v15, 0.0  ;;  %v633_v20 = vmul.f32 0.2, %v569_v15  ;;  %v554_v21 = vadd.f32 %v1415_v42, %v350_v18  ;;  %v764_v27 = vadd.f32 %v1428_v47, %v508_v19 }
  0xc4   : > { %vm827_vm3 = vcmp.ge.f32.partialorder %v795_v16, 0.0  ;;  %v859_v22 = vmul.f32 0.2, %v795_v16  ;;  %v780_v23 = vadd.f32 %v748_v14, %v715_v17  ;;  %v463_v24 = vpop.f32.mrf.mxu1 }
  0xc5   : > { %v665_v25 = vsel %vm601_vm2, %v569_v15, %v633_v20  ;;  %vm586_vm4 = vcmp.ge.f32.partialorder %v554_v21, 0.0  ;;  %v618_v26 = vmul.f32 0.2, %v554_v21  ;;  %v749_v36 = vadd.f32 %v1428_v47, %v463_v24 }
  0xc6   : > { %v891_v28 = vsel %vm827_vm3, %v795_v16, %v859_v22  ;;  %v698_v29 = vmul.f32 %v1423_v45, %v665_v25  ;;  %vm812_vm5 = vcmp.ge.f32.partialorder %v780_v23, 0.0  ;;  %v844_v30 = vmul.f32 0.2, %v780_v23 }
  0xc7   : > { %923 = vst [vmem:[%s1448_s20 + $0x98] sm:$0xff] %v891_v28  ;;  %v650_v31 = vsel %vm586_vm4, %v554_v21, %v618_v26 }
  0xc8   : > { %v876_v32 = vsel %vm812_vm5, %v780_v23, %v844_v30  ;;  %v683_v33 = vmul.f32 %v1423_v45, %v650_v31  ;;  %v731_v34 = vadd.f32 %v1433_v49, %v698_v29  ;;  %v398_v35 = vpop.f32.mrf.mxu2 }
  0xc9   : > { %908 = vst [vmem:[%s1448_s20 + $0x20] sm:$0xff] %v876_v32  ;;  %v570_v37 = vadd.f32 %v1415_v42, %v398_v35 }
  0xca   : > { %v796_v38 = vadd.f32 %v764_v27, %v731_v34  ;;  %v716_v39 = vadd.f32 %v1433_v49, %v683_v33  ;;  %v353_v40 = vpop.f32.mrf.mxu0  ;;  %v511_v41 = vpop.f32.mrf.mxu3 }
  0xcb   : > { %vm602_vm6 = vcmp.ge.f32.partialorder %v570_v37, 0.0  ;;  %v634_v43 = vmul.f32 0.2, %v570_v37  ;;  %v555_v44 = vadd.f32 %v1415_v42, %v353_v40  ;;  %v765_v53 = vadd.f32 %v1428_v47, %v511_v41 }
  0xcc   : > { %vm828_vm7 = vcmp.ge.f32.partialorder %v796_v38, 0.0  ;;  %v860_v46 = vmul.f32 0.2, %v796_v38  ;;  %v781_v48 = vadd.f32 %v749_v36, %v716_v39  ;;  %v466_v50 = vpop.f32.mrf.mxu1 }
  0xcd   : > { %v666_v51 = vsel %vm602_vm6, %v570_v37, %v634_v43  ;;  %vm587_vm8 = vcmp.ge.f32.partialorder %v555_v44, 0.0  ;;  %v619_v52 = vmul.f32 0.2, %v555_v44  ;;  %v750_v62 = vadd.f32 %v1428_v47, %v466_v50 }
  0xce   : > { %v892_v54 = vsel %vm828_vm7, %v796_v38, %v860_v46  ;;  %v699_v55 = vmul.f32 %v1423_v45, %v666_v51  ;;  %vm813_vm9 = vcmp.ge.f32.partialorder %v781_v48, 0.0  ;;  %v845_v56 = vmul.f32 0.2, %v781_v48 }
  0xcf   : > { %924 = vst [vmem:[%s1448_s20 + $0xa0] sm:$0xff] %v892_v54  ;;  %v651_v57 = vsel %vm587_vm8, %v555_v44, %v619_v52 }
  0xd0   : > { %v877_v58 = vsel %vm813_vm9, %v781_v48, %v845_v56  ;;  %v684_v59 = vmul.f32 %v1423_v45, %v651_v57  ;;  %v732_v60 = vadd.f32 %v1433_v49, %v699_v55  ;;  %v401_v61 = vpop.f32.mrf.mxu2 }
  0xd1   : > { %909 = vst [vmem:[%s1448_s20 + $0x28] sm:$0xff] %v877_v58  ;;  %v571_v63 = vadd.f32 %v1415_v42, %v401_v61 }
  0xd2   : > { %v797_v0 = vadd.f32 %v765_v53, %v732_v60  ;;  %v717_v1 = vadd.f32 %v1433_v49, %v684_v59  ;;  %v356_v2 = vpop.f32.mrf.mxu0  ;;  %v514_v3 = vpop.f32.mrf.mxu3 }
  0xd3   : > { %vm603_vm10 = vcmp.ge.f32.partialorder %v571_v63, 0.0  ;;  %v635_v4 = vmul.f32 0.2, %v571_v63  ;;  %v556_v5 = vadd.f32 %v1415_v42, %v356_v2  ;;  %v766_v11 = vadd.f32 %v1428_v47, %v514_v3 }
  0xd4   : > { %vm829_vm11 = vcmp.ge.f32.partialorder %v797_v0, 0.0  ;;  %v861_v6 = vmul.f32 0.2, %v797_v0  ;;  %v782_v7 = vadd.f32 %v750_v62, %v717_v1  ;;  %v469_v8 = vpop.f32.mrf.mxu1 }
  0xd5   : > { %v667_v9 = vsel %vm603_vm10, %v571_v63, %v635_v4  ;;  %vm588_vm12 = vcmp.ge.f32.partialorder %v556_v5, 0.0  ;;  %v620_v10 = vmul.f32 0.2, %v556_v5  ;;  %v751_v20 = vadd.f32 %v1428_v47, %v469_v8 }
  0xd6   : > { %v893_v12 = vsel %vm829_vm11, %v797_v0, %v861_v6  ;;  %v700_v13 = vmul.f32 %v1423_v45, %v667_v9  ;;  %vm814_vm13 = vcmp.ge.f32.partialorder %v782_v7, 0.0  ;;  %v846_v14 = vmul.f32 0.2, %v782_v7 }
  0xd7   : > { %925 = vst [vmem:[%s1448_s20 + $0xa8] sm:$0xff] %v893_v12  ;;  %v652_v15 = vsel %vm588_vm12, %v556_v5, %v620_v10 }
  0xd8   : > { %v878_v16 = vsel %vm814_vm13, %v782_v7, %v846_v14  ;;  %v685_v17 = vmul.f32 %v1423_v45, %v652_v15  ;;  %v733_v18 = vadd.f32 %v1433_v49, %v700_v13  ;;  %v404_v19 = vpop.f32.mrf.mxu2 }
  0xd9   : > { %910 = vst [vmem:[%s1448_s20 + $0x30] sm:$0xff] %v878_v16  ;;  %v572_v21 = vadd.f32 %v1415_v42, %v404_v19 }
  0xda   : > { %v798_v22 = vadd.f32 %v766_v11, %v733_v18  ;;  %v718_v23 = vadd.f32 %v1433_v49, %v685_v17  ;;  %v359_v24 = vpop.f32.mrf.mxu0  ;;  %v517_v25 = vpop.f32.mrf.mxu3 }
  0xdb   : > { %vm604_vm14 = vcmp.ge.f32.partialorder %v572_v21, 0.0  ;;  %v636_v26 = vmul.f32 0.2, %v572_v21  ;;  %v557_v27 = vadd.f32 %v1415_v42, %v359_v24  ;;  %v767_v33 = vadd.f32 %v1428_v47, %v517_v25 }
  0xdc   : > { %vm830_vm15 = vcmp.ge.f32.partialorder %v798_v22, 0.0  ;;  %v862_v28 = vmul.f32 0.2, %v798_v22  ;;  %v783_v29 = vadd.f32 %v751_v20, %v718_v23  ;;  %v472_v30 = vpop.f32.mrf.mxu1 }
  0xdd   : > { %v668_v31 = vsel %vm604_vm14, %v572_v21, %v636_v26  ;;  %vm589_vm0 = vcmp.ge.f32.partialorder %v557_v27, 0.0  ;;  %v621_v32 = vmul.f32 0.2, %v557_v27  ;;  %v752_v43 = vadd.f32 %v1428_v47, %v472_v30 }
  0xde   : > { %v894_v34 = vsel %vm830_vm15, %v798_v22, %v862_v28  ;;  %v701_v35 = vmul.f32 %v1423_v45, %v668_v31  ;;  %vm815_vm1 = vcmp.ge.f32.partialorder %v783_v29, 0.0  ;;  %v847_v36 = vmul.f32 0.2, %v783_v29 }
  0xdf   : > { %926 = vst [vmem:[%s1448_s20 + $0xb0] sm:$0xff] %v894_v34  ;;  %v653_v37 = vsel %vm589_vm0, %v557_v27, %v621_v32 }
  0xe0   : > { %v879_v38 = vsel %vm815_vm1, %v783_v29, %v847_v36  ;;  %v686_v39 = vmul.f32 %v1423_v45, %v653_v37  ;;  %v734_v40 = vadd.f32 %v1433_v49, %v701_v35  ;;  %v407_v41 = vpop.f32.mrf.mxu2 }
  0xe1   : > { %911 = vst [vmem:[%s1448_s20 + $0x38] sm:$0xff] %v879_v38  ;;  %v573_v44 = vadd.f32 %v1415_v42, %v407_v41 }
  0xe2   : > { %v799_v46 = vadd.f32 %v767_v33, %v734_v40  ;;  %v719_v48 = vadd.f32 %v1433_v49, %v686_v39  ;;  %v362_v50 = vpop.f32.mrf.mxu0  ;;  %v520_v51 = vpop.f32.mrf.mxu3 }
  0xe3   : > { %vm605_vm2 = vcmp.ge.f32.partialorder %v573_v44, 0.0  ;;  %v637_v52 = vmul.f32 0.2, %v573_v44  ;;  %v558_v53 = vadd.f32 %v1415_v42, %v362_v50  ;;  %v768_v59 = vadd.f32 %v1428_v47, %v520_v51 }
  0xe4   : > { %vm831_vm3 = vcmp.ge.f32.partialorder %v799_v46, 0.0  ;;  %v863_v54 = vmul.f32 0.2, %v799_v46  ;;  %v784_v55 = vadd.f32 %v752_v43, %v719_v48  ;;  %v475_v56 = vpop.f32.mrf.mxu1 }
  0xe5   : > { %v669_v57 = vsel %vm605_vm2, %v573_v44, %v637_v52  ;;  %vm590_vm4 = vcmp.ge.f32.partialorder %v558_v53, 0.0  ;;  %v622_v58 = vmul.f32 0.2, %v558_v53  ;;  %v753_v4 = vadd.f32 %v1428_v47, %v475_v56 }
  0xe6   : > { %v895_v60 = vsel %vm831_vm3, %v799_v46, %v863_v54  ;;  %v702_v61 = vmul.f32 %v1423_v45, %v669_v57  ;;  %vm816_vm5 = vcmp.ge.f32.partialorder %v784_v55, 0.0  ;;  %v848_v62 = vmul.f32 0.2, %v784_v55 }
  0xe7   : > { %927 = vst [vmem:[%s1448_s20 + $0xb8] sm:$0xff] %v895_v60  ;;  %v654_v63 = vsel %vm590_vm4, %v558_v53, %v622_v58 }
  0xe8   : > { %v880_v0 = vsel %vm816_vm5, %v784_v55, %v848_v62  ;;  %v687_v1 = vmul.f32 %v1423_v45, %v654_v63  ;;  %v735_v2 = vadd.f32 %v1433_v49, %v702_v61  ;;  %v410_v3 = vpop.f32.mrf.mxu2 }
  0xe9   : > { %912 = vst [vmem:[%s1448_s20 + $0x40] sm:$0xff] %v880_v0  ;;  %v574_v5 = vadd.f32 %v1415_v42, %v410_v3 }
  0xea   : > { %v800_v6 = vadd.f32 %v768_v59, %v735_v2  ;;  %v720_v7 = vadd.f32 %v1433_v49, %v687_v1  ;;  %v365_v8 = vpop.f32.mrf.mxu0  ;;  %v523_v9 = vpop.f32.mrf.mxu3 }
  0xeb   : > { %vm606_vm6 = vcmp.ge.f32.partialorder %v574_v5, 0.0  ;;  %v638_v10 = vmul.f32 0.2, %v574_v5  ;;  %v559_v11 = vadd.f32 %v1415_v42, %v365_v8  ;;  %v769_v17 = vadd.f32 %v1428_v47, %v523_v9 }
  0xec   : > { %vm832_vm7 = vcmp.ge.f32.partialorder %v800_v6, 0.0  ;;  %v864_v12 = vmul.f32 0.2, %v800_v6  ;;  %v785_v13 = vadd.f32 %v753_v4, %v720_v7  ;;  %v478_v14 = vpop.f32.mrf.mxu1 }
  0xed   : > { %v670_v15 = vsel %vm606_vm6, %v574_v5, %v638_v10  ;;  %vm591_vm8 = vcmp.ge.f32.partialorder %v559_v11, 0.0  ;;  %v623_v16 = vmul.f32 0.2, %v559_v11  ;;  %v754_v26 = vadd.f32 %v1428_v47, %v478_v14 }
  0xee   : > { %v896_v18 = vsel %vm832_vm7, %v800_v6, %v864_v12  ;;  %v703_v19 = vmul.f32 %v1423_v45, %v670_v15  ;;  %vm817_vm9 = vcmp.ge.f32.partialorder %v785_v13, 0.0  ;;  %v849_v20 = vmul.f32 0.2, %v785_v13 }
  0xef   : > { %928 = vst [vmem:[%s1448_s20 + $0xc0] sm:$0xff] %v896_v18  ;;  %v655_v21 = vsel %vm591_vm8, %v559_v11, %v623_v16 }
  0xf0   : > { %v881_v22 = vsel %vm817_vm9, %v785_v13, %v849_v20  ;;  %v688_v23 = vmul.f32 %v1423_v45, %v655_v21  ;;  %v736_v24 = vadd.f32 %v1433_v49, %v703_v19  ;;  %v413_v25 = vpop.f32.mrf.mxu2 }
  0xf1   : > { %913 = vst [vmem:[%s1448_s20 + $0x48] sm:$0xff] %v881_v22  ;;  %v575_v27 = vadd.f32 %v1415_v42, %v413_v25 }
  0xf2   : > { %v801_v28 = vadd.f32 %v769_v17, %v736_v24  ;;  %v721_v29 = vadd.f32 %v1433_v49, %v688_v23  ;;  %v368_v30 = vpop.f32.mrf.mxu0  ;;  %v526_v31 = vpop.f32.mrf.mxu3 }
  0xf3   : > { %vm607_vm10 = vcmp.ge.f32.partialorder %v575_v27, 0.0  ;;  %v639_v32 = vmul.f32 0.2, %v575_v27  ;;  %v560_v33 = vadd.f32 %v1415_v42, %v368_v30  ;;  %v770_v39 = vadd.f32 %v1428_v47, %v526_v31 }
  0xf4   : > { %vm833_vm11 = vcmp.ge.f32.partialorder %v801_v28, 0.0  ;;  %v865_v34 = vmul.f32 0.2, %v801_v28  ;;  %v786_v35 = vadd.f32 %v754_v26, %v721_v29  ;;  %v481_v36 = vpop.f32.mrf.mxu1 }
  0xf5   : > { %v671_v37 = vsel %vm607_vm10, %v575_v27, %v639_v32  ;;  %vm592_vm12 = vcmp.ge.f32.partialorder %v560_v33, 0.0  ;;  %v624_v38 = vmul.f32 0.2, %v560_v33  ;;  %v755_v52 = vadd.f32 %v1428_v47, %v481_v36 }
  0xf6   : > { %v897_v40 = vsel %vm833_vm11, %v801_v28, %v865_v34  ;;  %v704_v41 = vmul.f32 %v1423_v45, %v671_v37  ;;  %vm818_vm13 = vcmp.ge.f32.partialorder %v786_v35, 0.0  ;;  %v850_v43 = vmul.f32 0.2, %v786_v35 }
  0xf7   : > { %929 = vst [vmem:[%s1448_s20 + $0xc8] sm:$0xff] %v897_v40  ;;  %v656_v44 = vsel %vm592_vm12, %v560_v33, %v624_v38 }
  0xf8   : > { %v882_v46 = vsel %vm818_vm13, %v786_v35, %v850_v43  ;;  %v689_v48 = vmul.f32 %v1423_v45, %v656_v44  ;;  %v737_v50 = vadd.f32 %v1433_v49, %v704_v41  ;;  %v416_v51 = vpop.f32.mrf.mxu2 }
  0xf9   : > { %914 = vst [vmem:[%s1448_s20 + $0x50] sm:$0xff] %v882_v46  ;;  %v576_v53 = vadd.f32 %v1415_v42, %v416_v51 }
  0xfa   : > { %v802_v54 = vadd.f32 %v770_v39, %v737_v50  ;;  %v722_v55 = vadd.f32 %v1433_v49, %v689_v48  ;;  %v371_v56 = vpop.f32.mrf.mxu0  ;;  %v529_v57 = vpop.f32.mrf.mxu3 }
  0xfb   : > { %vm608_vm14 = vcmp.ge.f32.partialorder %v576_v53, 0.0  ;;  %v640_v58 = vmul.f32 0.2, %v576_v53  ;;  %v561_v59 = vadd.f32 %v1415_v42, %v371_v56  ;;  %v771_v1 = vadd.f32 %v1428_v47, %v529_v57 }
  0xfc   : > { %vm834_vm15 = vcmp.ge.f32.partialorder %v802_v54, 0.0  ;;  %v866_v60 = vmul.f32 0.2, %v802_v54  ;;  %v787_v61 = vadd.f32 %v755_v52, %v722_v55  ;;  %v484_v62 = vpop.f32.mrf.mxu1 }
  0xfd   : > { %v672_v63 = vsel %vm608_vm14, %v576_v53, %v640_v58  ;;  %vm593_vm0 = vcmp.ge.f32.partialorder %v561_v59, 0.0  ;;  %v625_v0 = vmul.f32 0.2, %v561_v59  ;;  %v756_v10 = vadd.f32 %v1428_v47, %v484_v62 }
  0xfe   : > { %v898_v2 = vsel %vm834_vm15, %v802_v54, %v866_v60  ;;  %v705_v3 = vmul.f32 %v1423_v45, %v672_v63  ;;  %vm819_vm1 = vcmp.ge.f32.partialorder %v787_v61, 0.0  ;;  %v851_v4 = vmul.f32 0.2, %v787_v61 }
  0xff   : > { %930 = vst [vmem:[%s1448_s20 + $0xd0] sm:$0xff] %v898_v2  ;;  %v657_v5 = vsel %vm593_vm0, %v561_v59, %v625_v0 }
 0x100   : > { %v883_v6 = vsel %vm819_vm1, %v787_v61, %v851_v4  ;;  %v690_v7 = vmul.f32 %v1423_v45, %v657_v5  ;;  %v738_v8 = vadd.f32 %v1433_v49, %v705_v3  ;;  %v419_v9 = vpop.f32.mrf.mxu2 }
 0x101   : > { %915 = vst [vmem:[%s1448_s20 + $0x58] sm:$0xff] %v883_v6  ;;  %v577_v11 = vadd.f32 %v1415_v42, %v419_v9 }
 0x102   : > { %v803_v12 = vadd.f32 %v771_v1, %v738_v8  ;;  %v723_v13 = vadd.f32 %v1433_v49, %v690_v7  ;;  %v374_v14 = vpop.f32.mrf.mxu0  ;;  %v532_v15 = vpop.f32.mrf.mxu3 }
 0x103   : > { %vm609_vm2 = vcmp.ge.f32.partialorder %v577_v11, 0.0  ;;  %v641_v16 = vmul.f32 0.2, %v577_v11  ;;  %v562_v17 = vadd.f32 %v1415_v42, %v374_v14  ;;  %v772_v23 = vadd.f32 %v1428_v47, %v532_v15 }
 0x104   : > { %vm835_vm3 = vcmp.ge.f32.partialorder %v803_v12, 0.0  ;;  %v867_v18 = vmul.f32 0.2, %v803_v12  ;;  %v788_v19 = vadd.f32 %v756_v10, %v723_v13  ;;  %v487_v20 = vpop.f32.mrf.mxu1 }
 0x105   : > { %v673_v21 = vsel %vm609_vm2, %v577_v11, %v641_v16  ;;  %vm594_vm4 = vcmp.ge.f32.partialorder %v562_v17, 0.0  ;;  %v626_v22 = vmul.f32 0.2, %v562_v17  ;;  %v757_v32 = vadd.f32 %v1428_v47, %v487_v20 }
 0x106   : > { %v899_v24 = vsel %vm835_vm3, %v803_v12, %v867_v18  ;;  %v706_v25 = vmul.f32 %v1423_v45, %v673_v21  ;;  %vm820_vm5 = vcmp.ge.f32.partialorder %v788_v19, 0.0  ;;  %v852_v26 = vmul.f32 0.2, %v788_v19 }
 0x107   : > { %931 = vst [vmem:[%s1448_s20 + $0xd8] sm:$0xff] %v899_v24  ;;  %v658_v27 = vsel %vm594_vm4, %v562_v17, %v626_v22 }
 0x108   : > { %v884_v28 = vsel %vm820_vm5, %v788_v19, %v852_v26  ;;  %v691_v29 = vmul.f32 %v1423_v45, %v658_v27  ;;  %v739_v30 = vadd.f32 %v1433_v49, %v706_v25  ;;  %v422_v31 = vpop.f32.mrf.mxu2 }
 0x109   : > { %916 = vst [vmem:[%s1448_s20 + $0x60] sm:$0xff] %v884_v28  ;;  %v578_v33 = vadd.f32 %v1415_v42, %v422_v31 }
 0x10a   : > { %v804_v34 = vadd.f32 %v772_v23, %v739_v30  ;;  %v724_v35 = vadd.f32 %v1433_v49, %v691_v29  ;;  %v377_v36 = vpop.f32.mrf.mxu0  ;;  %v535_v37 = vpop.f32.mrf.mxu3 }
 0x10b   : > { %vm610_vm6 = vcmp.ge.f32.partialorder %v578_v33, 0.0  ;;  %v642_v38 = vmul.f32 0.2, %v578_v33  ;;  %v563_v39 = vadd.f32 %v1415_v42, %v377_v36  ;;  %v773_v48 = vadd.f32 %v1428_v47, %v535_v37 }
 0x10c   : > { %vm836_vm7 = vcmp.ge.f32.partialorder %v804_v34, 0.0  ;;  %v868_v40 = vmul.f32 0.2, %v804_v34  ;;  %v789_v41 = vadd.f32 %v757_v32, %v724_v35  ;;  %v490_v43 = vpop.f32.mrf.mxu1 }
 0x10d   : > { %v674_v44 = vsel %vm610_vm6, %v578_v33, %v642_v38  ;;  %vm595_vm8 = vcmp.ge.f32.partialorder %v563_v39, 0.0  ;;  %v627_v46 = vmul.f32 0.2, %v563_v39  ;;  %v758_v58 = vadd.f32 %v1428_v47, %v490_v43 }
 0x10e   : > { %v900_v50 = vsel %vm836_vm7, %v804_v34, %v868_v40  ;;  %v707_v51 = vmul.f32 %v1423_v45, %v674_v44  ;;  %vm821_vm9 = vcmp.ge.f32.partialorder %v789_v41, 0.0  ;;  %v853_v52 = vmul.f32 0.2, %v789_v41 }
 0x10f   : > { %932 = vst [vmem:[%s1448_s20 + $0xe0] sm:$0xff] %v900_v50  ;;  %v659_v53 = vsel %vm595_vm8, %v563_v39, %v627_v46 }
 0x110   : > { %v885_v54 = vsel %vm821_vm9, %v789_v41, %v853_v52  ;;  %v692_v55 = vmul.f32 %v1423_v45, %v659_v53  ;;  %v740_v56 = vadd.f32 %v1433_v49, %v707_v51  ;;  %v425_v57 = vpop.f32.mrf.mxu2 }
 0x111   : > { %917 = vst [vmem:[%s1448_s20 + $0x68] sm:$0xff] %v885_v54  ;;  %v579_v59 = vadd.f32 %v1415_v42, %v425_v57 }
 0x112   : > { %v805_v60 = vadd.f32 %v773_v48, %v740_v56  ;;  %v725_v61 = vadd.f32 %v1433_v49, %v692_v55  ;;  %v380_v62 = vpop.f32.mrf.mxu0  ;;  %v538_v63 = vpop.f32.mrf.mxu3 }
 0x113   : > { %vm611_vm10 = vcmp.ge.f32.partialorder %v579_v59, 0.0  ;;  %v643_v0 = vmul.f32 0.2, %v579_v59  ;;  %v564_v1 = vadd.f32 %v1415_v42, %v380_v62  ;;  %v774_v6 = vadd.f32 %v1428_v47, %v538_v63 }
 0x114   : > { %vm837_vm11 = vcmp.ge.f32.partialorder %v805_v60, 0.0  ;;  %v869_v2 = vmul.f32 0.2, %v805_v60  ;;  %v790_v3 = vadd.f32 %v758_v58, %v725_v61  ;;  %v493_v7 = vpop.f32.mrf.mxu1 }
 0x115   : > { %v675_v4 = vsel %vm611_vm10, %v579_v59, %v643_v0  ;;  %vm596_vm12 = vcmp.ge.f32.partialorder %v564_v1, 0.0  ;;  %v628_v5 = vmul.f32 0.2, %v564_v1  ;;  %v759_v16 = vadd.f32 %v1428_v47, %v493_v7 }
 0x116   : > { %v901_v8 = vsel %vm837_vm11, %v805_v60, %v869_v2  ;;  %v708_v9 = vmul.f32 %v1423_v45, %v675_v4  ;;  %vm822_vm13 = vcmp.ge.f32.partialorder %v790_v3, 0.0  ;;  %v854_v10 = vmul.f32 0.2, %v790_v3 }
 0x117   : > { %933 = vst [vmem:[%s1448_s20 + $0xe8] sm:$0xff] %v901_v8  ;;  %v660_v11 = vsel %vm596_vm12, %v564_v1, %v628_v5 }
 0x118   : > { %v886_v12 = vsel %vm822_vm13, %v790_v3, %v854_v10  ;;  %v693_v13 = vmul.f32 %v1423_v45, %v660_v11  ;;  %v741_v14 = vadd.f32 %v1433_v49, %v708_v9  ;;  %v428_v15 = vpop.f32.mrf.mxu2 }
 0x119   : > { %918 = vst [vmem:[%s1448_s20 + $0x70] sm:$0xff] %v886_v12  ;;  %v580_v17 = vadd.f32 %v1415_v42, %v428_v15 }
 0x11a   : > { %v806_v18 = vadd.f32 %v774_v6, %v741_v14  ;;  %v726_v19 = vadd.f32 %v1433_v49, %v693_v13  ;;  %v541_v20 = vpop.f32.mrf.mxu3 }
 0x11b   : > { %vm612_vm14 = vcmp.ge.f32.partialorder %v580_v17, 0.0  ;;  %v644_v21 = vmul.f32 0.2, %v580_v17  ;;  %v775_v25 = vadd.f32 %v1428_v47, %v541_v20 }
 0x11c   : > { %vm838_vm15 = vcmp.ge.f32.partialorder %v806_v18, 0.0  ;;  %v870_v22 = vmul.f32 0.2, %v806_v18  ;;  %v791_v23 = vadd.f32 %v759_v16, %v726_v19 }
 0x11d   : > { %v676_v24 = vsel %vm612_vm14, %v580_v17, %v644_v21 }
 0x11e   : > { %v902_v26 = vsel %vm838_vm15, %v806_v18, %v870_v22  ;;  %v709_v27 = vmul.f32 %v1423_v45, %v676_v24  ;;  %vm823_vm0 = vcmp.ge.f32.partialorder %v791_v23, 0.0  ;;  %v855_v42 = vmul.f32 0.2, %v791_v23 }
 0x11f   : > { %934 = vst [vmem:[%s1448_s20 + $0xf0] sm:$0xff] %v902_v26 }
 0x120   : > { %v887_v28 = vsel %vm823_vm0, %v791_v23, %v855_v42  ;;  %v742_v29 = vadd.f32 %v1433_v49, %v709_v27 }
 0x121   : > { %919 = vst [vmem:[%s1448_s20 + $0x78] sm:$0xff] %v887_v28 }
 0x122   : > { %v807_v47 = vadd.f32 %v775_v25, %v742_v29 }
 0x124   : > { %vm839_vm1 = vcmp.ge.f32.partialorder %v807_v47, 0.0  ;;  %v871_v30 = vmul.f32 0.2, %v807_v47 }
 0x126   : > { %v903_v45 = vsel %vm839_vm1, %v807_v47, %v871_v30 }
 0x127   : > { %935 = vst [vmem:[%s1448_s20 + $0xf8] sm:$0xff] %v903_v45 }
 0x128   : > { %1175 = shalt.err (!%p1172_p3)
}
 0x129   : > { %s1212_s10 = smov 128   ;;  %s1213_s11 = smov 8  }
 0x12a   : > { %1103 = dma.vmem_to_hbm [thread:$0]  (%p1272_p5), %s950_s16, 4096, %s952_s29, %s937_s28, %s1212_s10, %s1212_s10, %s1213_s11  }
 0x12b PF: > { %p1109_p4 = scmp.ge.s32.totalorder %s1210_s15, 2  ;;  %s966_s17 = sand.u32 1, %s1198_s12  }
 0x12c   : > { %s967_s19 = scalar_lea.sflag [#allocation3], %s966_s17 }
 0x12d   : > { %p1106_p7 = pnand %p1109_p4, %p1276_p6 }
 0x12f   : > { %p1107_p8 = pneg %p1106_p7 }
 0x131   : > { %1193 = dma.done.wait (%p1107_p8), %s967_s19, 4096  }
 0x132   : > { %1195 = vsyncadd (%p1107_p8), %s967_s19, 4294963200  ;;  %p13_p9 = scmp.ge.s32.totalorder %s1259_s18, 4   ;;  %s1639_s12 = smov %s1202_s13 }
 0x133   : > { %s1640_s13 = smov %s1206_s14  ;;  %s1641_s14 = smov %s1270_s21 }
 0x134   : > { %s1642_s15 = smov %s1259_s18  ;;  %15 = sbr.rel (!%p13_p9) target bundleno = 3 (0x3), region = 67 }
 0x139   :  { %973 = vsyncpa [#allocation3], 1 }
 0x13a   :  { %975 = vsyncpa [#allocation3 + $0x1], 1 }

// kernel: tpu_custom_call.1
= control target key start
LH: loop header
LB: loop body
LE: loop exit
PB: predicated region body
PF: predicated region fallthrough
CT: control target
= control target key end

     0   :  { %8 = vsyncpa [#allocation3], 0  ;;  %s1633_s0 = inlined_call_operand.vmem [shape: f32[512,36], index: 0, kind: input, shape index: {}]   ;;  %s1634_s1 = inlined_call_operand.vmem [shape: f32[36,256], index: 1, kind: input, shape index: {}]   ;;  %s1635_s2 = inlined_call_operand.vmem [shape: f32[8,128], index: 2, kind: input, shape index: {}]   ;;  %s1636_s3 = inlined_call_operand.hbm [shape: f32[512,128], index: 3, kind: output, shape index: {}]  }
   0x1   :  { %10 = vsyncpa [#allocation3 + $0x1], 0  ;;  %s1234_s12 = smov 0   ;;  %s1236_s13 = smov 0  }
   0x2   :  { %s1238_s14 = smov 0   ;;  %s1240_s15 = smov 0  }
   0x3 LB: > { %s1255_s16 = sadd.s32 4294967295, %s1210_s15   ;;  %s1014_s17 = sadd.s32 4294967294, %s1210_s15   ;;  %s1210_s15 = sphi %s1240_s15, %s1642_s15   ;;  %s1206_s14 = sphi %s1238_s14, %s1641_s14   ;;  %s1202_s13 = sphi %s1236_s13, %s1640_s13   ;;  %s1198_s12 = sphi %s1234_s12, %s1639_s12  }
   0x4   : > { %s1259_s18 = sadd.s32 1, %s1210_s15   ;;  %s91_s19 = sadd.s32 1, %s1206_s14 }
   0x5   : > { %s88_s20 = ssub.s32 %s1210_s15, %s1259_s18  ;;  %p101_p0 = scmp.ne.s32.totalorder %s1206_s14, %s1202_s13 }
   0x6   : > { %p89_p1 = scmp.eq.s32.totalorder %s88_s20, 0  ;;  %p102_p2 = scmp.eq.s32.totalorder %s1255_s16, 1 }
   0x7   : > { %p107_p3 = scmp.ne.s32.totalorder %s1202_s13, %s1198_s12  ;;  %p108_p4 = scmp.eq.s32.totalorder %s1014_s17, 1 }
   0x8   : > { %s1270_s21 = scalar_select %p89_p1, %s1206_s14, %s91_s19  }
   0x9   : > { %p1272_p5 = por %p102_p2, %p101_p0  ;;  %p1276_p6 = por %p108_p4, %p107_p3 }
   0xa   : > { %p1017_p7 = scmp.ge.s32.totalorder %s1210_s15, 1  ;;  %p141_p8 = scmp.lt.s32.totalorder %s1210_s15, 3 }
   0xc   : > { %p142_p9 = pnand %p1017_p7, %p141_p8 }
   0xd   : > { %s1019_s28 = sshll.u32 (!%p142_p9), %s1255_s16, 5  ;;  %s1092_s24 = sshll.u32 (!%p142_p9), %s1255_s16, 8 }
   0xe   : > { %145 = sbr.rel (%p142_p9) target bundleno = 299 (0x12b), region = 32  ;;  %p166_p10 = scmp.lt.s32.totalorder (!%p142_p9), %s1019_s28, 63 }
   0xf   : > { %s948_s27 = scalar_lea.hbm (!%p142_p9), %s1636_s3, %s1092_s24  ;;  %s1168_s7 = scalar_lea.hbm (!%p142_p9), %s1636_s3, 512 }
  0x13   : > { %v212_v0 = vld [vmem:[%s1634_s1 + $0x40] sm:$0xf]  ;;  %vm311_vm0 = vcmask 1043456   ;;  %v210_v1 = vld [vmem:[%s1634_s1 + $0x30] sm:$0xff]  ;;  %v213_v2 = vld [vmem:[%s1634_s1 + $0x48] sm:$0xf] }
  0x14   : > { %1093 = vmatpush.msk.msra.mxu2 %vm311_vm0, %v212_v0  ;;  %1021 = vmatpush.msk.msra.mxu0 %vm311_vm0, %v212_v0  ;;  %v208_v3 = vld [vmem:[%s1634_s1 + $0x20] sm:$0xff]  ;;  %v211_v4 = vld [vmem:[%s1634_s1 + $0x38] sm:$0xff]  ;;  %s1644_s28 = smov (!%p166_p10, %s1019_s28), 63  ;;  %v209_v5 = vld [vmem:[%s1634_s1 + $0x28] sm:$0xff]  ;;  %vm214_vm1 = vcmask 293888  }
  0x15   : > { %1098 = vmatpush.msk.msra.mxu3 %vm311_vm0, %v213_v2  ;;  %1054 = vmatpush.msk.msra.mxu1 %vm311_vm0, %v213_v2  ;;  %v206_v6 = vld [vmem:[%s1634_s1 + $0x10] sm:$0xff]  ;;  %s1020_s17 = sshll.u32 %s1644_s28, 3  ;;  %v207_v7 = vld [vmem:[%s1634_s1 + $0x18] sm:$0xff]  ;;  %v204_v8 = vld [vmem:[%s1634_s1] sm:$0xff] }
  0x16   : > { %1094 = vmatpush.msra.mxu2 %v210_v1  ;;  %330 = vmatpush.msra.mxu0 %v210_v1  ;;  %s1313_s29 = scalar_lea.vmem %s1633_s0, %s1020_s17  ;;  %v205_v11 = vld [vmem:[%s1634_s1 + $0x8] sm:$0xff]  ;;  %v1415_v42 = vld [vmem:[%s1635_s2] ss:$0 sm:$0xff]  ;;  %v1423_v45 = vld [vmem:[%s1635_s2 + $0x1] ss:$0 sm:$0xff]  ;;  %s162_s17 = sand.u32 1, %s1202_s13  }
  0x17   : > { %1099 = vmatpush.msra.mxu3 %v211_v4  ;;  %443 = vmatpush.msra.mxu1 %v211_v4  ;;  %v188_v9 = vld [vmem:[%s1313_s29 + $0x80] sm:$0xff]  ;;  %v189_v12 = vld [vmem:[%s1313_s29 + $0x88] sm:$0xff]  ;;  %v190_v14 = vld [vmem:[%s1313_s29 + $0x90] sm:$0xff]  ;;  %s1018_s19 = sshll.u32 %s162_s17, 8  ;;  %s937_s28 = scalar_lea.sflag [#allocation3], %s162_s17 }
  0x18   : > { %1095 = vmatpush.msra.mxu2 %v208_v3  ;;  %331 = vmatpush.msra.mxu0 %v208_v3  ;;  %v172_v10 = vld [vmem:[%s1313_s29] sm:$0xff]  ;;  %v173_v13 = vld [vmem:[%s1313_s29 + $0x8] sm:$0xff]  ;;  %v174_v15 = vld [vmem:[%s1313_s29 + $0x10] sm:$0xff]  ;;  %s1448_s20 = scalar_lea.vmem [#allocation2], %s1018_s19 }
  0x19   : > { %1100 = vmatpush.msra.mxu3 %v209_v5  ;;  %444 = vmatpush.msra.mxu1 %v209_v5  ;;  %v191_v16 = vld [vmem:[%s1313_s29 + $0x98] sm:$0xff]  ;;  %v192_v18 = vld [vmem:[%s1313_s29 + $0xa0] sm:$0xff]  ;;  %v193_v20 = vld [vmem:[%s1313_s29 + $0xa8] sm:$0xff]  ;;  %s949_s16 = sshll.u32 %s1448_s20, 4  ;;  %s950_s16 = int_to_ptr.vmem [resolvable:$true] %s949_s16 }
  0x1a   : > { %1096 = vmatpush.msra.mxu2 %v206_v6  ;;  %332 = vmatpush.msra.mxu0 %v206_v6  ;;  %v175_v17 = vld [vmem:[%s1313_s29 + $0x18] sm:$0xff]  ;;  %v176_v19 = vld [vmem:[%s1313_s29 + $0x20] sm:$0xff]  ;;  %v177_v21 = vld [vmem:[%s1313_s29 + $0x28] sm:$0xff] }
  0x1b   : > { %1101 = vmatpush.msra.mxu3 %v207_v7  ;;  %445 = vmatpush.msra.mxu1 %v207_v7  ;;  %v194_v22 = vld [vmem:[%s1313_s29 + $0xb0] sm:$0xff]  ;;  %v195_v24 = vld [vmem:[%s1313_s29 + $0xb8] sm:$0xff]  ;;  %v196_v26 = vld [vmem:[%s1313_s29 + $0xc0] sm:$0xff] }
  0x1c   : > { %1097 = vmatpush.msra.mxu2 %v204_v8  ;;  %333 = vmatpush.msra.mxu0 %v204_v8  ;;  %v178_v23 = vld [vmem:[%s1313_s29 + $0x30] sm:$0xff]  ;;  %v179_v25 = vld [vmem:[%s1313_s29 + $0x38] sm:$0xff]  ;;  %v180_v27 = vld [vmem:[%s1313_s29 + $0x40] sm:$0xff] }
  0x1d   : > { %1038 = vmatmul.msk.f32.vlgmr.msra.gmra.mxu2 %vm214_vm1, %v188_v9  ;;  %1022 = vmatmul.msk.f32.vlgmr.msra.gmra.mxu0 %vm214_vm1, %v172_v10  ;;  %v197_v28 = vld [vmem:[%s1313_s29 + $0xc8] sm:$0xff]  ;;  %v198_v30 = vld [vmem:[%s1313_s29 + $0xd0] sm:$0xff]  ;;  %v199_v32 = vld [vmem:[%s1313_s29 + $0xd8] sm:$0xff] }
  0x1e   : > { %1102 = vmatpush.msra.mxu3 %v205_v11  ;;  %446 = vmatpush.msra.mxu1 %v205_v11  ;;  %v181_v29 = vld [vmem:[%s1313_s29 + $0x48] sm:$0xff]  ;;  %v182_v31 = vld [vmem:[%s1313_s29 + $0x50] sm:$0xff]  ;;  %v183_v33 = vld [vmem:[%s1313_s29 + $0x58] sm:$0xff] }
  0x1f   : > { %1071 = vmatmul.msk.f32.vlgmr.msra.gmra.mxu3 %vm214_vm1, %v188_v9  ;;  %1055 = vmatmul.msk.f32.vlgmr.msra.gmra.mxu1 %vm214_vm1, %v172_v10  ;;  %v200_v34 = vld [vmem:[%s1313_s29 + $0xe0] sm:$0xff]  ;;  %v201_v36 = vld [vmem:[%s1313_s29 + $0xe8] sm:$0xff]  ;;  %v202_v38 = vld [vmem:[%s1313_s29 + $0xf0] sm:$0xff] }
  0x20   : > { %v184_v35 = vld [vmem:[%s1313_s29 + $0x60] sm:$0xff]  ;;  %v185_v37 = vld [vmem:[%s1313_s29 + $0x68] sm:$0xff]  ;;  %v186_v39 = vld [vmem:[%s1313_s29 + $0x70] sm:$0xff] }
  0x21   : > { %v203_v40 = vld [vmem:[%s1313_s29 + $0xf8] sm:$0xff]  ;;  %v1428_v47 = vld [vmem:[%s1635_s2 + $0x3] ss:$0 sm:$0xff]  ;;  %v1433_v49 = vld [vmem:[%s1635_s2 + $0x2] ss:$0 sm:$0xff] }
  0x22   : > { %v187_v41 = vld [vmem:[%s1313_s29 + $0x78] sm:$0xff]  ;;  %s951_s29 = sshll.u32 %s948_s27, 4  ;;  %s952_s29 = int_to_ptr.hbm [resolvable:$true] %s951_s29 }
  0x23   : > { %s1162_s30 = sshra.s32 %s952_s29, 4  ;;  %s1163_s30 = int_to_ptr.hbm [resolvable:$true] %s1162_s30 }
  0x24   : > { %s1164_s4 = scalar_lea.hbm %s1163_s30, 256  ;;  %p1169_p0 = scmp.lt.s32.totalorder %s1163_s30, %s1636_s3 }
  0x25   : > { %1039 = vmatmul.msk.f32.gmra.mxu2 %vm214_vm1, %v189_v12  ;;  %1023 = vmatmul.msk.f32.gmra.mxu0 %vm214_vm1, %v173_v13  ;;  %p1165_p11 = scmp.ne.s32.totalorder %s1163_s30, %s1164_s4  ;;  %p1170_p1 = scmp.lt.s32.totalorder %s1168_s7, %s1164_s4 }
  0x27   : > { %1072 = vmatmul.msk.f32.gmra.mxu3 %vm214_vm1, %v189_v12  ;;  %1056 = vmatmul.msk.f32.gmra.mxu1 %vm214_vm1, %v173_v13  ;;  %p1166_p12 = pnand %p1165_p11, %p1272_p5  ;;  %p1171_p2 = por %p1170_p1, %p1169_p0 }
  0x29   : > { %p1167_p13 = pneg %p1166_p12 }
  0x2b   : > { %p1172_p3 = pnand %p1171_p2, %p1167_p13 }
  0x2d   : > { %1040 = vmatmul.msk.f32.gmra.mxu2 %vm214_vm1, %v190_v14  ;;  %1024 = vmatmul.msk.f32.gmra.mxu0 %vm214_vm1, %v174_v15 }
  0x2f   : > { %1073 = vmatmul.msk.f32.gmra.mxu3 %vm214_vm1, %v190_v14  ;;  %1057 = vmatmul.msk.f32.gmra.mxu1 %vm214_vm1, %v174_v15 }
  0x35   : > { %1041 = vmatmul.msk.f32.gmra.mxu2 %vm214_vm1, %v191_v16  ;;  %1025 = vmatmul.msk.f32.gmra.mxu0 %vm214_vm1, %v175_v17 }
  0x37   : > { %1074 = vmatmul.msk.f32.gmra.mxu3 %vm214_vm1, %v191_v16  ;;  %1058 = vmatmul.msk.f32.gmra.mxu1 %vm214_vm1, %v175_v17 }
  0x3d   : > { %1042 = vmatmul.msk.f32.gmra.mxu2 %vm214_vm1, %v192_v18  ;;  %1026 = vmatmul.msk.f32.gmra.mxu0 %vm214_vm1, %v176_v19 }
  0x3f   : > { %1075 = vmatmul.msk.f32.gmra.mxu3 %vm214_vm1, %v192_v18  ;;  %1059 = vmatmul.msk.f32.gmra.mxu1 %vm214_vm1, %v176_v19 }
  0x45   : > { %1043 = vmatmul.msk.f32.gmra.mxu2 %vm214_vm1, %v193_v20  ;;  %1027 = vmatmul.msk.f32.gmra.mxu0 %vm214_vm1, %v177_v21 }
  0x47   : > { %1076 = vmatmul.msk.f32.gmra.mxu3 %vm214_vm1, %v193_v20  ;;  %1060 = vmatmul.msk.f32.gmra.mxu1 %vm214_vm1, %v177_v21 }
  0x4d   : > { %1044 = vmatmul.msk.f32.gmra.mxu2 %vm214_vm1, %v194_v22  ;;  %1028 = vmatmul.msk.f32.gmra.mxu0 %vm214_vm1, %v178_v23 }
  0x4f   : > { %1077 = vmatmul.msk.f32.gmra.mxu3 %vm214_vm1, %v194_v22  ;;  %1061 = vmatmul.msk.f32.gmra.mxu1 %vm214_vm1, %v178_v23 }
  0x55   : > { %1045 = vmatmul.msk.f32.gmra.mxu2 %vm214_vm1, %v195_v24  ;;  %1029 = vmatmul.msk.f32.gmra.mxu0 %vm214_vm1, %v179_v25 }
  0x57   : > { %1078 = vmatmul.msk.f32.gmra.mxu3 %vm214_vm1, %v195_v24  ;;  %1062 = vmatmul.msk.f32.gmra.mxu1 %vm214_vm1, %v179_v25 }
  0x5d   : > { %1046 = vmatmul.msk.f32.gmra.mxu2 %vm214_vm1, %v196_v26  ;;  %1030 = vmatmul.msk.f32.gmra.mxu0 %vm214_vm1, %v180_v27 }
  0x5f   : > { %1079 = vmatmul.msk.f32.gmra.mxu3 %vm214_vm1, %v196_v26  ;;  %1063 = vmatmul.msk.f32.gmra.mxu1 %vm214_vm1, %v180_v27 }
  0x65   : > { %1047 = vmatmul.msk.f32.gmra.mxu2 %vm214_vm1, %v197_v28  ;;  %1031 = vmatmul.msk.f32.gmra.mxu0 %vm214_vm1, %v181_v29 }
  0x67   : > { %1080 = vmatmul.msk.f32.gmra.mxu3 %vm214_vm1, %v197_v28  ;;  %1064 = vmatmul.msk.f32.gmra.mxu1 %vm214_vm1, %v181_v29 }
  0x6d   : > { %1048 = vmatmul.msk.f32.gmra.mxu2 %vm214_vm1, %v198_v30  ;;  %1032 = vmatmul.msk.f32.gmra.mxu0 %vm214_vm1, %v182_v31 }
  0x6f   : > { %1081 = vmatmul.msk.f32.gmra.mxu3 %vm214_vm1, %v198_v30  ;;  %1065 = vmatmul.msk.f32.gmra.mxu1 %vm214_vm1, %v182_v31 }
  0x75   : > { %1049 = vmatmul.msk.f32.gmra.mxu2 %vm214_vm1, %v199_v32  ;;  %1033 = vmatmul.msk.f32.gmra.mxu0 %vm214_vm1, %v183_v33 }
  0x77   : > { %1082 = vmatmul.msk.f32.gmra.mxu3 %vm214_vm1, %v199_v32  ;;  %1066 = vmatmul.msk.f32.gmra.mxu1 %vm214_vm1, %v183_v33 }
  0x7d   : > { %1050 = vmatmul.msk.f32.gmra.mxu2 %vm214_vm1, %v200_v34  ;;  %1034 = vmatmul.msk.f32.gmra.mxu0 %vm214_vm1, %v184_v35 }
  0x7f   : > { %1083 = vmatmul.msk.f32.gmra.mxu3 %vm214_vm1, %v200_v34  ;;  %1067 = vmatmul.msk.f32.gmra.mxu1 %vm214_vm1, %v184_v35 }
  0x85   : > { %1051 = vmatmul.msk.f32.gmra.mxu2 %vm214_vm1, %v201_v36  ;;  %1035 = vmatmul.msk.f32.gmra.mxu0 %vm214_vm1, %v185_v37 }
  0x87   : > { %1084 = vmatmul.msk.f32.gmra.mxu3 %vm214_vm1, %v201_v36  ;;  %1068 = vmatmul.msk.f32.gmra.mxu1 %vm214_vm1, %v185_v37 }
  0x8d   : > { %1052 = vmatmul.msk.f32.gmra.mxu2 %vm214_vm1, %v202_v38  ;;  %1036 = vmatmul.msk.f32.gmra.mxu0 %vm214_vm1, %v186_v39 }
  0x8f   : > { %1085 = vmatmul.msk.f32.gmra.mxu3 %vm214_vm1, %v202_v38  ;;  %1069 = vmatmul.msk.f32.gmra.mxu1 %vm214_vm1, %v186_v39 }
  0x95   : > { %1053 = vmatmul.msk.f32.gmra.mxu2 %vm214_vm1, %v203_v40  ;;  %1037 = vmatmul.msk.f32.gmra.mxu0 %vm214_vm1, %v187_v41 }
  0x97   : > { %1086 = vmatmul.msk.f32.gmra.mxu3 %vm214_vm1, %v203_v40  ;;  %1070 = vmatmul.msk.f32.gmra.mxu1 %vm214_vm1, %v187_v41 }
  0x9a   : > { %v335_v43 = vpop.f32.mrf.mxu0 }
  0x9b   : > { %v549_v44 = vadd.f32 %v1415_v42, %v335_v43 }
  0x9c   : > { %v448_v46 = vpop.f32.mrf.mxu1 }
  0x9d   : > { %vm581_vm2 = vcmp.ge.f32.partialorder %v549_v44, 0.0  ;;  %v613_v48 = vmul.f32 0.2, %v549_v44  ;;  %v744_v53 = vadd.f32 %v1428_v47, %v448_v46 }
  0x9f   : > { %v645_v50 = vsel %vm581_vm2, %v549_v44, %v613_v48 }
  0xa0   : > { %v678_v51 = vmul.f32 %v1423_v45, %v645_v50  ;;  %v383_v52 = vpop.f32.mrf.mxu2 }
  0xa1   : > { %v565_v54 = vadd.f32 %v1415_v42, %v383_v52 }
  0xa2   : > { %v711_v55 = vadd.f32 %v1433_v49, %v678_v51  ;;  %v338_v56 = vpop.f32.mrf.mxu0  ;;  %v496_v57 = vpop.f32.mrf.mxu3 }
  0xa3   : > { %vm597_vm3 = vcmp.ge.f32.partialorder %v565_v54, 0.0  ;;  %v629_v58 = vmul.f32 0.2, %v565_v54  ;;  %v550_v59 = vadd.f32 %v1415_v42, %v338_v56  ;;  %v760_v2 = vadd.f32 %v1428_v47, %v496_v57 }
  0xa4   : > { %v776_v60 = vadd.f32 %v744_v53, %v711_v55  ;;  %v451_v61 = vpop.f32.mrf.mxu1 }
  0xa5   : > { %v661_v62 = vsel %vm597_vm3, %v565_v54, %v629_v58  ;;  %vm582_vm4 = vcmp.ge.f32.partialorder %v550_v59, 0.0  ;;  %v614_v63 = vmul.f32 0.2, %v550_v59  ;;  %v745_v8 = vadd.f32 %v1428_v47, %v451_v61 }
  0xa6   : > { %v694_v0 = vmul.f32 %v1423_v45, %v661_v62  ;;  %vm808_vm5 = vcmp.ge.f32.partialorder %v776_v60, 0.0  ;;  %v840_v1 = vmul.f32 0.2, %v776_v60 }
  0xa7   : > { %v646_v3 = vsel %vm582_vm4, %v550_v59, %v614_v63 }
  0xa8   : > { %v872_v4 = vsel %vm808_vm5, %v776_v60, %v840_v1  ;;  %v679_v5 = vmul.f32 %v1423_v45, %v646_v3  ;;  %v727_v6 = vadd.f32 %v1433_v49, %v694_v0  ;;  %v386_v7 = vpop.f32.mrf.mxu2 }
  0xa9   : > { %904 = vst [vmem:[%s1448_s20] sm:$0xff] %v872_v4  ;;  %v566_v9 = vadd.f32 %v1415_v42, %v386_v7 }
  0xaa   : > { %v792_v10 = vadd.f32 %v760_v2, %v727_v6  ;;  %v712_v11 = vadd.f32 %v1433_v49, %v679_v5  ;;  %v341_v12 = vpop.f32.mrf.mxu0  ;;  %v499_v13 = vpop.f32.mrf.mxu3 }
  0xab   : > { %vm598_vm6 = vcmp.ge.f32.partialorder %v566_v9, 0.0  ;;  %v630_v14 = vmul.f32 0.2, %v566_v9  ;;  %v551_v15 = vadd.f32 %v1415_v42, %v341_v12  ;;  %v761_v21 = vadd.f32 %v1428_v47, %v499_v13 }
  0xac   : > { %vm824_vm7 = vcmp.ge.f32.partialorder %v792_v10, 0.0  ;;  %v856_v16 = vmul.f32 0.2, %v792_v10  ;;  %v777_v17 = vadd.f32 %v745_v8, %v712_v11  ;;  %v454_v18 = vpop.f32.mrf.mxu1 }
  0xad   : > { %v662_v19 = vsel %vm598_vm6, %v566_v9, %v630_v14  ;;  %vm583_vm8 = vcmp.ge.f32.partialorder %v551_v15, 0.0  ;;  %v615_v20 = vmul.f32 0.2, %v551_v15  ;;  %v746_v30 = vadd.f32 %v1428_v47, %v454_v18 }
  0xae   : > { %v888_v22 = vsel %vm824_vm7, %v792_v10, %v856_v16  ;;  %v695_v23 = vmul.f32 %v1423_v45, %v662_v19  ;;  %vm809_vm9 = vcmp.ge.f32.partialorder %v777_v17, 0.0  ;;  %v841_v24 = vmul.f32 0.2, %v777_v17 }
  0xaf   : > { %920 = vst [vmem:[%s1448_s20 + $0x80] sm:$0xff] %v888_v22  ;;  %v647_v25 = vsel %vm583_vm8, %v551_v15, %v615_v20 }
  0xb0   : > { %v873_v26 = vsel %vm809_vm9, %v777_v17, %v841_v24  ;;  %v680_v27 = vmul.f32 %v1423_v45, %v647_v25  ;;  %v728_v28 = vadd.f32 %v1433_v49, %v695_v23  ;;  %v389_v29 = vpop.f32.mrf.mxu2 }
  0xb1   : > { %905 = vst [vmem:[%s1448_s20 + $0x8] sm:$0xff] %v873_v26  ;;  %v567_v31 = vadd.f32 %v1415_v42, %v389_v29 }
  0xb2   : > { %v793_v32 = vadd.f32 %v761_v21, %v728_v28  ;;  %v713_v33 = vadd.f32 %v1433_v49, %v680_v27  ;;  %v344_v34 = vpop.f32.mrf.mxu0  ;;  %v502_v35 = vpop.f32.mrf.mxu3 }
  0xb3   : > { %vm599_vm10 = vcmp.ge.f32.partialorder %v567_v31, 0.0  ;;  %v631_v36 = vmul.f32 0.2, %v567_v31  ;;  %v552_v37 = vadd.f32 %v1415_v42, %v344_v34  ;;  %v762_v44 = vadd.f32 %v1428_v47, %v502_v35 }
  0xb4   : > { %vm825_vm11 = vcmp.ge.f32.partialorder %v793_v32, 0.0  ;;  %v857_v38 = vmul.f32 0.2, %v793_v32  ;;  %v778_v39 = vadd.f32 %v746_v30, %v713_v33  ;;  %v457_v40 = vpop.f32.mrf.mxu1 }
  0xb5   : > { %v663_v41 = vsel %vm599_vm10, %v567_v31, %v631_v36  ;;  %vm584_vm12 = vcmp.ge.f32.partialorder %v552_v37, 0.0  ;;  %v616_v43 = vmul.f32 0.2, %v552_v37  ;;  %v747_v56 = vadd.f32 %v1428_v47, %v457_v40 }
  0xb6   : > { %v889_v46 = vsel %vm825_vm11, %v793_v32, %v857_v38  ;;  %v696_v48 = vmul.f32 %v1423_v45, %v663_v41  ;;  %vm810_vm13 = vcmp.ge.f32.partialorder %v778_v39, 0.0  ;;  %v842_v50 = vmul.f32 0.2, %v778_v39 }
  0xb7   : > { %921 = vst [vmem:[%s1448_s20 + $0x88] sm:$0xff] %v889_v46  ;;  %v648_v51 = vsel %vm584_vm12, %v552_v37, %v616_v43 }
  0xb8   : > { %v874_v52 = vsel %vm810_vm13, %v778_v39, %v842_v50  ;;  %v681_v53 = vmul.f32 %v1423_v45, %v648_v51  ;;  %v729_v54 = vadd.f32 %v1433_v49, %v696_v48  ;;  %v392_v55 = vpop.f32.mrf.mxu2 }
  0xb9   : > { %906 = vst [vmem:[%s1448_s20 + $0x10] sm:$0xff] %v874_v52  ;;  %v568_v57 = vadd.f32 %v1415_v42, %v392_v55 }
  0xba   : > { %v794_v58 = vadd.f32 %v762_v44, %v729_v54  ;;  %v714_v59 = vadd.f32 %v1433_v49, %v681_v53  ;;  %v347_v60 = vpop.f32.mrf.mxu0  ;;  %v505_v61 = vpop.f32.mrf.mxu3 }
  0xbb   : > { %vm600_vm14 = vcmp.ge.f32.partialorder %v568_v57, 0.0  ;;  %v632_v62 = vmul.f32 0.2, %v568_v57  ;;  %v553_v63 = vadd.f32 %v1415_v42, %v347_v60  ;;  %v763_v5 = vadd.f32 %v1428_v47, %v505_v61 }
  0xbc   : > { %vm826_vm15 = vcmp.ge.f32.partialorder %v794_v58, 0.0  ;;  %v858_v0 = vmul.f32 0.2, %v794_v58  ;;  %v779_v1 = vadd.f32 %v747_v56, %v714_v59  ;;  %v460_v2 = vpop.f32.mrf.mxu1 }
  0xbd   : > { %v664_v3 = vsel %vm600_vm14, %v568_v57, %v632_v62  ;;  %vm585_vm0 = vcmp.ge.f32.partialorder %v553_v63, 0.0  ;;  %v617_v4 = vmul.f32 0.2, %v553_v63  ;;  %v748_v14 = vadd.f32 %v1428_v47, %v460_v2 }
  0xbe   : > { %v890_v6 = vsel %vm826_vm15, %v794_v58, %v858_v0  ;;  %v697_v7 = vmul.f32 %v1423_v45, %v664_v3  ;;  %vm811_vm1 = vcmp.ge.f32.partialorder %v779_v1, 0.0  ;;  %v843_v8 = vmul.f32 0.2, %v779_v1 }
  0xbf   : > { %922 = vst [vmem:[%s1448_s20 + $0x90] sm:$0xff] %v890_v6  ;;  %v649_v9 = vsel %vm585_vm0, %v553_v63, %v617_v4 }
  0xc0   : > { %v875_v10 = vsel %vm811_vm1, %v779_v1, %v843_v8  ;;  %v682_v11 = vmul.f32 %v1423_v45, %v649_v9  ;;  %v730_v12 = vadd.f32 %v1433_v49, %v697_v7  ;;  %v395_v13 = vpop.f32.mrf.mxu2 }
  0xc1   : > { %907 = vst [vmem:[%s1448_s20 + $0x18] sm:$0xff] %v875_v10  ;;  %v569_v15 = vadd.f32 %v1415_v42, %v395_v13 }
  0xc2   : > { %v795_v16 = vadd.f32 %v763_v5, %v730_v12  ;;  %v715_v17 = vadd.f32 %v1433_v49, %v682_v11  ;;  %v350_v18 = vpop.f32.mrf.mxu0  ;;  %v508_v19 = vpop.f32.mrf.mxu3 }
  0xc3   : > { %vm601_vm2 = vcmp.ge.f32.partialorder %v569_v15, 0.0  ;;  %v633_v20 = vmul.f32 0.2, %v569_v15  ;;  %v554_v21 = vadd.f32 %v1415_v42, %v350_v18  ;;  %v764_v27 = vadd.f32 %v1428_v47, %v508_v19 }
  0xc4   : > { %vm827_vm3 = vcmp.ge.f32.partialorder %v795_v16, 0.0  ;;  %v859_v22 = vmul.f32 0.2, %v795_v16  ;;  %v780_v23 = vadd.f32 %v748_v14, %v715_v17  ;;  %v463_v24 = vpop.f32.mrf.mxu1 }
  0xc5   : > { %v665_v25 = vsel %vm601_vm2, %v569_v15, %v633_v20  ;;  %vm586_vm4 = vcmp.ge.f32.partialorder %v554_v21, 0.0  ;;  %v618_v26 = vmul.f32 0.2, %v554_v21  ;;  %v749_v36 = vadd.f32 %v1428_v47, %v463_v24 }
  0xc6   : > { %v891_v28 = vsel %vm827_vm3, %v795_v16, %v859_v22  ;;  %v698_v29 = vmul.f32 %v1423_v45, %v665_v25  ;;  %vm812_vm5 = vcmp.ge.f32.partialorder %v780_v23, 0.0  ;;  %v844_v30 = vmul.f32 0.2, %v780_v23 }
  0xc7   : > { %923 = vst [vmem:[%s1448_s20 + $0x98] sm:$0xff] %v891_v28  ;;  %v650_v31 = vsel %vm586_vm4, %v554_v21, %v618_v26 }
  0xc8   : > { %v876_v32 = vsel %vm812_vm5, %v780_v23, %v844_v30  ;;  %v683_v33 = vmul.f32 %v1423_v45, %v650_v31  ;;  %v731_v34 = vadd.f32 %v1433_v49, %v698_v29  ;;  %v398_v35 = vpop.f32.mrf.mxu2 }
  0xc9   : > { %908 = vst [vmem:[%s1448_s20 + $0x20] sm:$0xff] %v876_v32  ;;  %v570_v37 = vadd.f32 %v1415_v42, %v398_v35 }
  0xca   : > { %v796_v38 = vadd.f32 %v764_v27, %v731_v34  ;;  %v716_v39 = vadd.f32 %v1433_v49, %v683_v33  ;;  %v353_v40 = vpop.f32.mrf.mxu0  ;;  %v511_v41 = vpop.f32.mrf.mxu3 }
  0xcb   : > { %vm602_vm6 = vcmp.ge.f32.partialorder %v570_v37, 0.0  ;;  %v634_v43 = vmul.f32 0.2, %v570_v37  ;;  %v555_v44 = vadd.f32 %v1415_v42, %v353_v40  ;;  %v765_v53 = vadd.f32 %v1428_v47, %v511_v41 }
  0xcc   : > { %vm828_vm7 = vcmp.ge.f32.partialorder %v796_v38, 0.0  ;;  %v860_v46 = vmul.f32 0.2, %v796_v38  ;;  %v781_v48 = vadd.f32 %v749_v36, %v716_v39  ;;  %v466_v50 = vpop.f32.mrf.mxu1 }
  0xcd   : > { %v666_v51 = vsel %vm602_vm6, %v570_v37, %v634_v43  ;;  %vm587_vm8 = vcmp.ge.f32.partialorder %v555_v44, 0.0  ;;  %v619_v52 = vmul.f32 0.2, %v555_v44  ;;  %v750_v62 = vadd.f32 %v1428_v47, %v466_v50 }
  0xce   : > { %v892_v54 = vsel %vm828_vm7, %v796_v38, %v860_v46  ;;  %v699_v55 = vmul.f32 %v1423_v45, %v666_v51  ;;  %vm813_vm9 = vcmp.ge.f32.partialorder %v781_v48, 0.0  ;;  %v845_v56 = vmul.f32 0.2, %v781_v48 }
  0xcf   : > { %924 = vst [vmem:[%s1448_s20 + $0xa0] sm:$0xff] %v892_v54  ;;  %v651_v57 = vsel %vm587_vm8, %v555_v44, %v619_v52 }
  0xd0   : > { %v877_v58 = vsel %vm813_vm9, %v781_v48, %v845_v56  ;;  %v684_v59 = vmul.f32 %v1423_v45, %v651_v57  ;;  %v732_v60 = vadd.f32 %v1433_v49, %v699_v55  ;;  %v401_v61 = vpop.f32.mrf.mxu2 }
  0xd1   : > { %909 = vst [vmem:[%s1448_s20 + $0x28] sm:$0xff] %v877_v58  ;;  %v571_v63 = vadd.f32 %v1415_v42, %v401_v61 }
  0xd2   : > { %v797_v0 = vadd.f32 %v765_v53, %v732_v60  ;;  %v717_v1 = vadd.f32 %v1433_v49, %v684_v59  ;;  %v356_v2 = vpop.f32.mrf.mxu0  ;;  %v514_v3 = vpop.f32.mrf.mxu3 }
  0xd3   : > { %vm603_vm10 = vcmp.ge.f32.partialorder %v571_v63, 0.0  ;;  %v635_v4 = vmul.f32 0.2, %v571_v63  ;;  %v556_v5 = vadd.f32 %v1415_v42, %v356_v2  ;;  %v766_v11 = vadd.f32 %v1428_v47, %v514_v3 }
  0xd4   : > { %vm829_vm11 = vcmp.ge.f32.partialorder %v797_v0, 0.0  ;;  %v861_v6 = vmul.f32 0.2, %v797_v0  ;;  %v782_v7 = vadd.f32 %v750_v62, %v717_v1  ;;  %v469_v8 = vpop.f32.mrf.mxu1 }
  0xd5   : > { %v667_v9 = vsel %vm603_vm10, %v571_v63, %v635_v4  ;;  %vm588_vm12 = vcmp.ge.f32.partialorder %v556_v5, 0.0  ;;  %v620_v10 = vmul.f32 0.2, %v556_v5  ;;  %v751_v20 = vadd.f32 %v1428_v47, %v469_v8 }
  0xd6   : > { %v893_v12 = vsel %vm829_vm11, %v797_v0, %v861_v6  ;;  %v700_v13 = vmul.f32 %v1423_v45, %v667_v9  ;;  %vm814_vm13 = vcmp.ge.f32.partialorder %v782_v7, 0.0  ;;  %v846_v14 = vmul.f32 0.2, %v782_v7 }
  0xd7   : > { %925 = vst [vmem:[%s1448_s20 + $0xa8] sm:$0xff] %v893_v12  ;;  %v652_v15 = vsel %vm588_vm12, %v556_v5, %v620_v10 }
  0xd8   : > { %v878_v16 = vsel %vm814_vm13, %v782_v7, %v846_v14  ;;  %v685_v17 = vmul.f32 %v1423_v45, %v652_v15  ;;  %v733_v18 = vadd.f32 %v1433_v49, %v700_v13  ;;  %v404_v19 = vpop.f32.mrf.mxu2 }
  0xd9   : > { %910 = vst [vmem:[%s1448_s20 + $0x30] sm:$0xff] %v878_v16  ;;  %v572_v21 = vadd.f32 %v1415_v42, %v404_v19 }
  0xda   : > { %v798_v22 = vadd.f32 %v766_v11, %v733_v18  ;;  %v718_v23 = vadd.f32 %v1433_v49, %v685_v17  ;;  %v359_v24 = vpop.f32.mrf.mxu0  ;;  %v517_v25 = vpop.f32.mrf.mxu3 }
  0xdb   : > { %vm604_vm14 = vcmp.ge.f32.partialorder %v572_v21, 0.0  ;;  %v636_v26 = vmul.f32 0.2, %v572_v21  ;;  %v557_v27 = vadd.f32 %v1415_v42, %v359_v24  ;;  %v767_v33 = vadd.f32 %v1428_v47, %v517_v25 }
  0xdc   : > { %vm830_vm15 = vcmp.ge.f32.partialorder %v798_v22, 0.0  ;;  %v862_v28 = vmul.f32 0.2, %v798_v22  ;;  %v783_v29 = vadd.f32 %v751_v20, %v718_v23  ;;  %v472_v30 = vpop.f32.mrf.mxu1 }
  0xdd   : > { %v668_v31 = vsel %vm604_vm14, %v572_v21, %v636_v26  ;;  %vm589_vm0 = vcmp.ge.f32.partialorder %v557_v27, 0.0  ;;  %v621_v32 = vmul.f32 0.2, %v557_v27  ;;  %v752_v43 = vadd.f32 %v1428_v47, %v472_v30 }
  0xde   : > { %v894_v34 = vsel %vm830_vm15, %v798_v22, %v862_v28  ;;  %v701_v35 = vmul.f32 %v1423_v45, %v668_v31  ;;  %vm815_vm1 = vcmp.ge.f32.partialorder %v783_v29, 0.0  ;;  %v847_v36 = vmul.f32 0.2, %v783_v29 }
  0xdf   : > { %926 = vst [vmem:[%s1448_s20 + $0xb0] sm:$0xff] %v894_v34  ;;  %v653_v37 = vsel %vm589_vm0, %v557_v27, %v621_v32 }
  0xe0   : > { %v879_v38 = vsel %vm815_vm1, %v783_v29, %v847_v36  ;;  %v686_v39 = vmul.f32 %v1423_v45, %v653_v37  ;;  %v734_v40 = vadd.f32 %v1433_v49, %v701_v35  ;;  %v407_v41 = vpop.f32.mrf.mxu2 }
  0xe1   : > { %911 = vst [vmem:[%s1448_s20 + $0x38] sm:$0xff] %v879_v38  ;;  %v573_v44 = vadd.f32 %v1415_v42, %v407_v41 }
  0xe2   : > { %v799_v46 = vadd.f32 %v767_v33, %v734_v40  ;;  %v719_v48 = vadd.f32 %v1433_v49, %v686_v39  ;;  %v362_v50 = vpop.f32.mrf.mxu0  ;;  %v520_v51 = vpop.f32.mrf.mxu3 }
  0xe3   : > { %vm605_vm2 = vcmp.ge.f32.partialorder %v573_v44, 0.0  ;;  %v637_v52 = vmul.f32 0.2, %v573_v44  ;;  %v558_v53 = vadd.f32 %v1415_v42, %v362_v50  ;;  %v768_v59 = vadd.f32 %v1428_v47, %v520_v51 }
  0xe4   : > { %vm831_vm3 = vcmp.ge.f32.partialorder %v799_v46, 0.0  ;;  %v863_v54 = vmul.f32 0.2, %v799_v46  ;;  %v784_v55 = vadd.f32 %v752_v43, %v719_v48  ;;  %v475_v56 = vpop.f32.mrf.mxu1 }
  0xe5   : > { %v669_v57 = vsel %vm605_vm2, %v573_v44, %v637_v52  ;;  %vm590_vm4 = vcmp.ge.f32.partialorder %v558_v53, 0.0  ;;  %v622_v58 = vmul.f32 0.2, %v558_v53  ;;  %v753_v4 = vadd.f32 %v1428_v47, %v475_v56 }
  0xe6   : > { %v895_v60 = vsel %vm831_vm3, %v799_v46, %v863_v54  ;;  %v702_v61 = vmul.f32 %v1423_v45, %v669_v57  ;;  %vm816_vm5 = vcmp.ge.f32.partialorder %v784_v55, 0.0  ;;  %v848_v62 = vmul.f32 0.2, %v784_v55 }
  0xe7   : > { %927 = vst [vmem:[%s1448_s20 + $0xb8] sm:$0xff] %v895_v60  ;;  %v654_v63 = vsel %vm590_vm4, %v558_v53, %v622_v58 }
  0xe8   : > { %v880_v0 = vsel %vm816_vm5, %v784_v55, %v848_v62  ;;  %v687_v1 = vmul.f32 %v1423_v45, %v654_v63  ;;  %v735_v2 = vadd.f32 %v1433_v49, %v702_v61  ;;  %v410_v3 = vpop.f32.mrf.mxu2 }
  0xe9   : > { %912 = vst [vmem:[%s1448_s20 + $0x40] sm:$0xff] %v880_v0  ;;  %v574_v5 = vadd.f32 %v1415_v42, %v410_v3 }
  0xea   : > { %v800_v6 = vadd.f32 %v768_v59, %v735_v2  ;;  %v720_v7 = vadd.f32 %v1433_v49, %v687_v1  ;;  %v365_v8 = vpop.f32.mrf.mxu0  ;;  %v523_v9 = vpop.f32.mrf.mxu3 }
  0xeb   : > { %vm606_vm6 = vcmp.ge.f32.partialorder %v574_v5, 0.0  ;;  %v638_v10 = vmul.f32 0.2, %v574_v5  ;;  %v559_v11 = vadd.f32 %v1415_v42, %v365_v8  ;;  %v769_v17 = vadd.f32 %v1428_v47, %v523_v9 }
  0xec   : > { %vm832_vm7 = vcmp.ge.f32.partialorder %v800_v6, 0.0  ;;  %v864_v12 = vmul.f32 0.2, %v800_v6  ;;  %v785_v13 = vadd.f32 %v753_v4, %v720_v7  ;;  %v478_v14 = vpop.f32.mrf.mxu1 }
  0xed   : > { %v670_v15 = vsel %vm606_vm6, %v574_v5, %v638_v10  ;;  %vm591_vm8 = vcmp.ge.f32.partialorder %v559_v11, 0.0  ;;  %v623_v16 = vmul.f32 0.2, %v559_v11  ;;  %v754_v26 = vadd.f32 %v1428_v47, %v478_v14 }
  0xee   : > { %v896_v18 = vsel %vm832_vm7, %v800_v6, %v864_v12  ;;  %v703_v19 = vmul.f32 %v1423_v45, %v670_v15  ;;  %vm817_vm9 = vcmp.ge.f32.partialorder %v785_v13, 0.0  ;;  %v849_v20 = vmul.f32 0.2, %v785_v13 }
  0xef   : > { %928 = vst [vmem:[%s1448_s20 + $0xc0] sm:$0xff] %v896_v18  ;;  %v655_v21 = vsel %vm591_vm8, %v559_v11, %v623_v16 }
  0xf0   : > { %v881_v22 = vsel %vm817_vm9, %v785_v13, %v849_v20  ;;  %v688_v23 = vmul.f32 %v1423_v45, %v655_v21  ;;  %v736_v24 = vadd.f32 %v1433_v49, %v703_v19  ;;  %v413_v25 = vpop.f32.mrf.mxu2 }
  0xf1   : > { %913 = vst [vmem:[%s1448_s20 + $0x48] sm:$0xff] %v881_v22  ;;  %v575_v27 = vadd.f32 %v1415_v42, %v413_v25 }
  0xf2   : > { %v801_v28 = vadd.f32 %v769_v17, %v736_v24  ;;  %v721_v29 = vadd.f32 %v1433_v49, %v688_v23  ;;  %v368_v30 = vpop.f32.mrf.mxu0  ;;  %v526_v31 = vpop.f32.mrf.mxu3 }
  0xf3   : > { %vm607_vm10 = vcmp.ge.f32.partialorder %v575_v27, 0.0  ;;  %v639_v32 = vmul.f32 0.2, %v575_v27  ;;  %v560_v33 = vadd.f32 %v1415_v42, %v368_v30  ;;  %v770_v39 = vadd.f32 %v1428_v47, %v526_v31 }
  0xf4   : > { %vm833_vm11 = vcmp.ge.f32.partialorder %v801_v28, 0.0  ;;  %v865_v34 = vmul.f32 0.2, %v801_v28  ;;  %v786_v35 = vadd.f32 %v754_v26, %v721_v29  ;;  %v481_v36 = vpop.f32.mrf.mxu1 }
  0xf5   : > { %v671_v37 = vsel %vm607_vm10, %v575_v27, %v639_v32  ;;  %vm592_vm12 = vcmp.ge.f32.partialorder %v560_v33, 0.0  ;;  %v624_v38 = vmul.f32 0.2, %v560_v33  ;;  %v755_v52 = vadd.f32 %v1428_v47, %v481_v36 }
  0xf6   : > { %v897_v40 = vsel %vm833_vm11, %v801_v28, %v865_v34  ;;  %v704_v41 = vmul.f32 %v1423_v45, %v671_v37  ;;  %vm818_vm13 = vcmp.ge.f32.partialorder %v786_v35, 0.0  ;;  %v850_v43 = vmul.f32 0.2, %v786_v35 }
  0xf7   : > { %929 = vst [vmem:[%s1448_s20 + $0xc8] sm:$0xff] %v897_v40  ;;  %v656_v44 = vsel %vm592_vm12, %v560_v33, %v624_v38 }
  0xf8   : > { %v882_v46 = vsel %vm818_vm13, %v786_v35, %v850_v43  ;;  %v689_v48 = vmul.f32 %v1423_v45, %v656_v44  ;;  %v737_v50 = vadd.f32 %v1433_v49, %v704_v41  ;;  %v416_v51 = vpop.f32.mrf.mxu2 }
  0xf9   : > { %914 = vst [vmem:[%s1448_s20 + $0x50] sm:$0xff] %v882_v46  ;;  %v576_v53 = vadd.f32 %v1415_v42, %v416_v51 }
  0xfa   : > { %v802_v54 = vadd.f32 %v770_v39, %v737_v50  ;;  %v722_v55 = vadd.f32 %v1433_v49, %v689_v48  ;;  %v371_v56 = vpop.f32.mrf.mxu0  ;;  %v529_v57 = vpop.f32.mrf.mxu3 }
  0xfb   : > { %vm608_vm14 = vcmp.ge.f32.partialorder %v576_v53, 0.0  ;;  %v640_v58 = vmul.f32 0.2, %v576_v53  ;;  %v561_v59 = vadd.f32 %v1415_v42, %v371_v56  ;;  %v771_v1 = vadd.f32 %v1428_v47, %v529_v57 }
  0xfc   : > { %vm834_vm15 = vcmp.ge.f32.partialorder %v802_v54, 0.0  ;;  %v866_v60 = vmul.f32 0.2, %v802_v54  ;;  %v787_v61 = vadd.f32 %v755_v52, %v722_v55  ;;  %v484_v62 = vpop.f32.mrf.mxu1 }
  0xfd   : > { %v672_v63 = vsel %vm608_vm14, %v576_v53, %v640_v58  ;;  %vm593_vm0 = vcmp.ge.f32.partialorder %v561_v59, 0.0  ;;  %v625_v0 = vmul.f32 0.2, %v561_v59  ;;  %v756_v10 = vadd.f32 %v1428_v47, %v484_v62 }
  0xfe   : > { %v898_v2 = vsel %vm834_vm15, %v802_v54, %v866_v60  ;;  %v705_v3 = vmul.f32 %v1423_v45, %v672_v63  ;;  %vm819_vm1 = vcmp.ge.f32.partialorder %v787_v61, 0.0  ;;  %v851_v4 = vmul.f32 0.2, %v787_v61 }
  0xff   : > { %930 = vst [vmem:[%s1448_s20 + $0xd0] sm:$0xff] %v898_v2  ;;  %v657_v5 = vsel %vm593_vm0, %v561_v59, %v625_v0 }
 0x100   : > { %v883_v6 = vsel %vm819_vm1, %v787_v61, %v851_v4  ;;  %v690_v7 = vmul.f32 %v1423_v45, %v657_v5  ;;  %v738_v8 = vadd.f32 %v1433_v49, %v705_v3  ;;  %v419_v9 = vpop.f32.mrf.mxu2 }
 0x101   : > { %915 = vst [vmem:[%s1448_s20 + $0x58] sm:$0xff] %v883_v6  ;;  %v577_v11 = vadd.f32 %v1415_v42, %v419_v9 }
 0x102   : > { %v803_v12 = vadd.f32 %v771_v1, %v738_v8  ;;  %v723_v13 = vadd.f32 %v1433_v49, %v690_v7  ;;  %v374_v14 = vpop.f32.mrf.mxu0  ;;  %v532_v15 = vpop.f32.mrf.mxu3 }
 0x103   : > { %vm609_vm2 = vcmp.ge.f32.partialorder %v577_v11, 0.0  ;;  %v641_v16 = vmul.f32 0.2, %v577_v11  ;;  %v562_v17 = vadd.f32 %v1415_v42, %v374_v14  ;;  %v772_v23 = vadd.f32 %v1428_v47, %v532_v15 }
 0x104   : > { %vm835_vm3 = vcmp.ge.f32.partialorder %v803_v12, 0.0  ;;  %v867_v18 = vmul.f32 0.2, %v803_v12  ;;  %v788_v19 = vadd.f32 %v756_v10, %v723_v13  ;;  %v487_v20 = vpop.f32.mrf.mxu1 }
 0x105   : > { %v673_v21 = vsel %vm609_vm2, %v577_v11, %v641_v16  ;;  %vm594_vm4 = vcmp.ge.f32.partialorder %v562_v17, 0.0  ;;  %v626_v22 = vmul.f32 0.2, %v562_v17  ;;  %v757_v32 = vadd.f32 %v1428_v47, %v487_v20 }
 0x106   : > { %v899_v24 = vsel %vm835_vm3, %v803_v12, %v867_v18  ;;  %v706_v25 = vmul.f32 %v1423_v45, %v673_v21  ;;  %vm820_vm5 = vcmp.ge.f32.partialorder %v788_v19, 0.0  ;;  %v852_v26 = vmul.f32 0.2, %v788_v19 }
 0x107   : > { %931 = vst [vmem:[%s1448_s20 + $0xd8] sm:$0xff] %v899_v24  ;;  %v658_v27 = vsel %vm594_vm4, %v562_v17, %v626_v22 }
 0x108   : > { %v884_v28 = vsel %vm820_vm5, %v788_v19, %v852_v26  ;;  %v691_v29 = vmul.f32 %v1423_v45, %v658_v27  ;;  %v739_v30 = vadd.f32 %v1433_v49, %v706_v25  ;;  %v422_v31 = vpop.f32.mrf.mxu2 }
 0x109   : > { %916 = vst [vmem:[%s1448_s20 + $0x60] sm:$0xff] %v884_v28  ;;  %v578_v33 = vadd.f32 %v1415_v42, %v422_v31 }
 0x10a   : > { %v804_v34 = vadd.f32 %v772_v23, %v739_v30  ;;  %v724_v35 = vadd.f32 %v1433_v49, %v691_v29  ;;  %v377_v36 = vpop.f32.mrf.mxu0  ;;  %v535_v37 = vpop.f32.mrf.mxu3 }
 0x10b   : > { %vm610_vm6 = vcmp.ge.f32.partialorder %v578_v33, 0.0  ;;  %v642_v38 = vmul.f32 0.2, %v578_v33  ;;  %v563_v39 = vadd.f32 %v1415_v42, %v377_v36  ;;  %v773_v48 = vadd.f32 %v1428_v47, %v535_v37 }
 0x10c   : > { %vm836_vm7 = vcmp.ge.f32.partialorder %v804_v34, 0.0  ;;  %v868_v40 = vmul.f32 0.2, %v804_v34  ;;  %v789_v41 = vadd.f32 %v757_v32, %v724_v35  ;;  %v490_v43 = vpop.f32.mrf.mxu1 }
 0x10d   : > { %v674_v44 = vsel %vm610_vm6, %v578_v33, %v642_v38  ;;  %vm595_vm8 = vcmp.ge.f32.partialorder %v563_v39, 0.0  ;;  %v627_v46 = vmul.f32 0.2, %v563_v39  ;;  %v758_v58 = vadd.f32 %v1428_v47, %v490_v43 }
 0x10e   : > { %v900_v50 = vsel %vm836_vm7, %v804_v34, %v868_v40  ;;  %v707_v51 = vmul.f32 %v1423_v45, %v674_v44  ;;  %vm821_vm9 = vcmp.ge.f32.partialorder %v789_v41, 0.0  ;;  %v853_v52 = vmul.f32 0.2, %v789_v41 }
 0x10f   : > { %932 = vst [vmem:[%s1448_s20 + $0xe0] sm:$0xff] %v900_v50  ;;  %v659_v53 = vsel %vm595_vm8, %v563_v39, %v627_v46 }
 0x110   : > { %v885_v54 = vsel %vm821_vm9, %v789_v41, %v853_v52  ;;  %v692_v55 = vmul.f32 %v1423_v45, %v659_v53  ;;  %v740_v56 = vadd.f32 %v1433_v49, %v707_v51  ;;  %v425_v57 = vpop.f32.mrf.mxu2 }
 0x111   : > { %917 = vst [vmem:[%s1448_s20 + $0x68] sm:$0xff] %v885_v54  ;;  %v579_v59 = vadd.f32 %v1415_v42, %v425_v57 }
 0x112   : > { %v805_v60 = vadd.f32 %v773_v48, %v740_v56  ;;  %v725_v61 = vadd.f32 %v1433_v49, %v692_v55  ;;  %v380_v62 = vpop.f32.mrf.mxu0  ;;  %v538_v63 = vpop.f32.mrf.mxu3 }
 0x113   : > { %vm611_vm10 = vcmp.ge.f32.partialorder %v579_v59, 0.0  ;;  %v643_v0 = vmul.f32 0.2, %v579_v59  ;;  %v564_v1 = vadd.f32 %v1415_v42, %v380_v62  ;;  %v774_v6 = vadd.f32 %v1428_v47, %v538_v63 }
 0x114   : > { %vm837_vm11 = vcmp.ge.f32.partialorder %v805_v60, 0.0  ;;  %v869_v2 = vmul.f32 0.2, %v805_v60  ;;  %v790_v3 = vadd.f32 %v758_v58, %v725_v61  ;;  %v493_v7 = vpop.f32.mrf.mxu1 }
 0x115   : > { %v675_v4 = vsel %vm611_vm10, %v579_v59, %v643_v0  ;;  %vm596_vm12 = vcmp.ge.f32.partialorder %v564_v1, 0.0  ;;  %v628_v5 = vmul.f32 0.2, %v564_v1  ;;  %v759_v16 = vadd.f32 %v1428_v47, %v493_v7 }
 0x116   : > { %v901_v8 = vsel %vm837_vm11, %v805_v60, %v869_v2  ;;  %v708_v9 = vmul.f32 %v1423_v45, %v675_v4  ;;  %vm822_vm13 = vcmp.ge.f32.partialorder %v790_v3, 0.0  ;;  %v854_v10 = vmul.f32 0.2, %v790_v3 }
 0x117   : > { %933 = vst [vmem:[%s1448_s20 + $0xe8] sm:$0xff] %v901_v8  ;;  %v660_v11 = vsel %vm596_vm12, %v564_v1, %v628_v5 }
 0x118   : > { %v886_v12 = vsel %vm822_vm13, %v790_v3, %v854_v10  ;;  %v693_v13 = vmul.f32 %v1423_v45, %v660_v11  ;;  %v741_v14 = vadd.f32 %v1433_v49, %v708_v9  ;;  %v428_v15 = vpop.f32.mrf.mxu2 }
 0x119   : > { %918 = vst [vmem:[%s1448_s20 + $0x70] sm:$0xff] %v886_v12  ;;  %v580_v17 = vadd.f32 %v1415_v42, %v428_v15 }
 0x11a   : > { %v806_v18 = vadd.f32 %v774_v6, %v741_v14  ;;  %v726_v19 = vadd.f32 %v1433_v49, %v693_v13  ;;  %v541_v20 = vpop.f32.mrf.mxu3 }
 0x11b   : > { %vm612_vm14 = vcmp.ge.f32.partialorder %v580_v17, 0.0  ;;  %v644_v21 = vmul.f32 0.2, %v580_v17  ;;  %v775_v25 = vadd.f32 %v1428_v47, %v541_v20 }
 0x11c   : > { %vm838_vm15 = vcmp.ge.f32.partialorder %v806_v18, 0.0  ;;  %v870_v22 = vmul.f32 0.2, %v806_v18  ;;  %v791_v23 = vadd.f32 %v759_v16, %v726_v19 }
 0x11d   : > { %v676_v24 = vsel %vm612_vm14, %v580_v17, %v644_v21 }
 0x11e   : > { %v902_v26 = vsel %vm838_vm15, %v806_v18, %v870_v22  ;;  %v709_v27 = vmul.f32 %v1423_v45, %v676_v24  ;;  %vm823_vm0 = vcmp.ge.f32.partialorder %v791_v23, 0.0  ;;  %v855_v42 = vmul.f32 0.2, %v791_v23 }
 0x11f   : > { %934 = vst [vmem:[%s1448_s20 + $0xf0] sm:$0xff] %v902_v26 }
 0x120   : > { %v887_v28 = vsel %vm823_vm0, %v791_v23, %v855_v42  ;;  %v742_v29 = vadd.f32 %v1433_v49, %v709_v27 }
 0x121   : > { %919 = vst [vmem:[%s1448_s20 + $0x78] sm:$0xff] %v887_v28 }
 0x122   : > { %v807_v47 = vadd.f32 %v775_v25, %v742_v29 }
 0x124   : > { %vm839_vm1 = vcmp.ge.f32.partialorder %v807_v47, 0.0  ;;  %v871_v30 = vmul.f32 0.2, %v807_v47 }
 0x126   : > { %v903_v45 = vsel %vm839_vm1, %v807_v47, %v871_v30 }
 0x127   : > { %935 = vst [vmem:[%s1448_s20 + $0xf8] sm:$0xff] %v903_v45 }
 0x128   : > { %1175 = shalt.err (!%p1172_p3)
}
 0x129   : > { %s1212_s10 = smov 128   ;;  %s1213_s11 = smov 8  }
 0x12a   : > { %1103 = dma.vmem_to_hbm [thread:$0]  (%p1272_p5), %s950_s16, 4096, %s952_s29, %s937_s28, %s1212_s10, %s1212_s10, %s1213_s11  }
 0x12b PF: > { %p1109_p4 = scmp.ge.s32.totalorder %s1210_s15, 2  ;;  %s966_s17 = sand.u32 1, %s1198_s12  }
 0x12c   : > { %s967_s19 = scalar_lea.sflag [#allocation3], %s966_s17 }
 0x12d   : > { %p1106_p7 = pnand %p1109_p4, %p1276_p6 }
 0x12f   : > { %p1107_p8 = pneg %p1106_p7 }
 0x131   : > { %1193 = dma.done.wait (%p1107_p8), %s967_s19, 4096  }
 0x132   : > { %1195 = vsyncadd (%p1107_p8), %s967_s19, 4294963200  ;;  %p13_p9 = scmp.ge.s32.totalorder %s1259_s18, 4   ;;  %s1639_s12 = smov %s1202_s13 }
 0x133   : > { %s1640_s13 = smov %s1206_s14  ;;  %s1641_s14 = smov %s1270_s21 }
 0x134   : > { %s1642_s15 = smov %s1259_s18  ;;  %15 = sbr.rel (!%p13_p9) target bundleno = 3 (0x3), region = 67 }
 0x139   :  { %973 = vsyncpa [#allocation3], 1 }
 0x13a   :  { %975 = vsyncpa [#allocation3 + $0x1], 1 }

</bundles_post_ra>
